<compile_context>
chip_gen: v6e
topology: v6e:2x2x1
jax: 0.10.0
libtpu: 0.0.40
codegen_flags: <defaults>
</compile_context>

<pallas_src>
import functools
import math

import jax
import jax.numpy as jnp
from jax.experimental import pallas as pl
from jax.experimental.pallas import tpu as pltpu


# --------------------------------------------------------------------------------------
# Fused kernel: input projection + recurrence over time + Linear(H->1) + sigmoid head
# --------------------------------------------------------------------------------------
def _lstm_fused_kernel(x_ref, wih_ref, whh_ref, b_ref, wlin_ref, blin_ref,
                       out_ref, h_scr, c_scr, *, T, TT, H):
    # x_ref    : (TB, TT, I) bf16   raw input chunk for this (batch tile, time chunk)
    # wih_ref  : (I, 4H) bf16       input weights  (gate order i, f, o, g)
    # whh_ref  : (H, 4H) bf16       recurrent weights (gate order i, f, o, g)
    # b_ref    : (1, 4H) f32        fused bias b_ih + b_hh
    # wlin_ref : (1, H)  f32        linear.weight row
    # blin_ref : (1, 1)  f32 SMEM   linear.bias
    # out_ref  : (1, TB) f32        lane-dense sigmoid(linear(h_T)) for this batch tile
    # h_scr/c_scr : (TB, H) f32 VMEM state, persistent across the time-chunk grid axis
    tc = pl.program_id(1)
    n_tc = pl.num_programs(1)
    TB = h_scr.shape[0]
    HALF = TB // 2          # two interleaved batch sub-tiles (MXU of one overlaps EUP of other)
    rem = T % TT            # static: #valid steps in the (possibly padded) last chunk

    @pl.when(tc == 0)
    def _():
        h_scr[...] = jnp.zeros_like(h_scr)
        c_scr[...] = jnp.zeros_like(c_scr)

    wih = wih_ref[...]
    whh = whh_ref[...]
    bias = b_ref[...]

    def cell(xp_half, h, c):
        # xp_half: (HALF, 4H) f32 precomputed x_t @ W_ih^T + b; only h @ W_hh^T is serial.
        # TODO(synk): push whh to MXU weight regs once per chunk instead of per step.
        gates = xp_half + jnp.dot(h.astype(jnp.bfloat16), whh,
                                  preferred_element_type=jnp.float32)
        # gate order (i, f, o, g): one sigmoid launch over 3H lanes, one tanh over H lanes.
        # TODO(synk): for H not a multiple of 128 the sub-H gate slices imply per-step lane
        # shifts (XLU); keep gates lane-aligned with hoisted masks/rolls if that shows up.
        sig = jax.nn.sigmoid(gates[:, :3 * H])
        g_g = jnp.tanh(gates[:, 3 * H:])
        c_n = sig[:, H:2 * H] * c + sig[:, :H] * g_g
        h_n = sig[:, 2 * H:] * jnp.tanh(c_n)
        return h_n, c_n

    hA, cA = h_scr[:HALF, :], c_scr[:HALF, :]
    hB, cB = h_scr[HALF:, :], c_scr[HALF:, :]

    # Fully unrolled time chunk: static slices everywhere; the LLO scheduler interleaves the
    # two independent sub-tiles and hoists the (off-critical-path) input projections.
    for s in range(TT):
        xproj = (jnp.dot(x_ref[:, s, :], wih, preferred_element_type=jnp.float32)
                 + bias)                                          # (TB, 4H) f32
        hA_n, cA_n = cell(xproj[:HALF], hA, cA)
        hB_n, cB_n = cell(xproj[HALF:], hB, cB)
        if rem != 0 and s >= rem:
            # This step index exists only as time padding in the last chunk: mask the state
            # update so padded steps are identity (zero-padded x alone is NOT identity).
            live = tc < n_tc - 1
            hA = jnp.where(live, hA_n, hA)
            cA = jnp.where(live, cA_n, cA)
            hB = jnp.where(live, hB_n, hB)
            cB = jnp.where(live, cB_n, cB)
        else:
            hA, cA, hB, cB = hA_n, cA_n, hB_n, cB_n

    h_scr[:HALF, :] = hA
    h_scr[HALF:, :] = hB
    c_scr[:HALF, :] = cA
    c_scr[HALF:, :] = cB

    @pl.when(tc == n_tc - 1)
    def _():
        # Linear(H -> 1) as a VPU multiply + lane reduction (no N=1 MXU matmul), then
        # sigmoid; stored lane-dense as a (1, TB) row.
        h_fin = h_scr[...]
        logits = jnp.sum(h_fin * wlin_ref[...], axis=-1) + blin_ref[0, 0]
        out_ref[...] = jax.nn.sigmoid(logits)[None, :].astype(out_ref.dtype)


# --------------------------------------------------------------------------------------
# Wrapper
# --------------------------------------------------------------------------------------
def shallow_regression_lstm(x, params, *, t_chunk=16, batch_tile=128):
    """x: (B, T, num_sensors) float32 (batch_first, like the PyTorch module). Returns (B,)."""
    B, T, I = x.shape
    H = params["whh_t"].shape[0]
    G4 = 4 * H

    # ---- batch tiling: TB a multiple of 16 (two >=8-sublane interleaved halves) ----
    B_pad = -(-B // 16) * 16
    if B_pad <= batch_tile:
        TB = B_pad                              # single batch tile
    else:
        TB = 128                                # keeps the lane-dense (1, B_pad) output legal
        B_pad = -(-B_pad // TB) * TB
    nb = B_pad // TB
    # TODO(synk): on v7x (2 TensorCores) with B_pad <= 128 the batch-parallel axis has a
    # single iteration and one core idles; halve TB (with an (nb, TB)-shaped output) or
    # shard the time axis if small-batch v7x throughput matters.

    # ---- time chunking: pad T to a multiple of TT; the padded tail is masked in-kernel ----
    TT = min(t_chunk, T)
    if TT < T:
        TT = max(8, (TT // 8) * 8)              # multi-chunk: block sublane dim must be 8-aligned
    T_pad = -(-T // TT) * TT
    n_tc = T_pad // TT

    # bf16 storage for the streamed input; accumulation / state / elementwise stay f32.
    x_p = jnp.pad(x.astype(jnp.float32),
                  ((0, B_pad - B), (0, T_pad - T), (0, 0))).astype(jnp.bfloat16)

    kernel = functools.partial(_lstm_fused_kernel, T=T, TT=TT, H=H)

    # VMEM footprint is tiny now (raw x chunk + weights + 2*(TB,H) state), so the default
    # scoped VMEM limit is fine on all of v5e/v6e/v7x.
    out_row = pl.pallas_call(
        kernel,
        out_shape=jax.ShapeDtypeStruct((1, B_pad), jnp.float32),
        grid=(nb, n_tc),
        in_specs=[
            pl.BlockSpec((TB, TT, I), lambda b, t: (b, t, 0)),    # raw x chunk (bf16)
            pl.BlockSpec((I, G4), lambda b, t: (0, 0)),           # W_ih^T (bf16)
            pl.BlockSpec((H, G4), lambda b, t: (0, 0)),           # W_hh^T (bf16)
            pl.BlockSpec((1, G4), lambda b, t: (0, 0)),           # fused bias (f32)
            pl.BlockSpec((1, H), lambda b, t: (0, 0)),            # linear weight row (f32)
            pl.BlockSpec(memory_space=pltpu.MemorySpace.SMEM),    # linear bias scalar
        ],
        out_specs=pl.BlockSpec((1, TB), lambda b, t: (0, b)),
        scratch_shapes=[
            pltpu.VMEM((TB, H), jnp.float32),   # h state
            pltpu.VMEM((TB, H), jnp.float32),   # c state
        ],
        compiler_params=pltpu.CompilerParams(
            dimension_semantics=("parallel", "arbitrary")),
    )(x_p, params["wih_t"], params["whh_t"], params["b"],
      params["wlin_row"], params["blin"])

    return out_row[0, :B]                        # == torch .flatten() on (B, 1)


# --------------------------------------------------------------------------------------
# Parameters: PyTorch-layout init + packing (gate reorder i,f,g,o -> i,f,o,g, bias fusion)
# --------------------------------------------------------------------------------------
def init_torch_like_params(key, num_sensors, hidden_units):
    """Shapes / init mirroring nn.LSTM + nn.Linear: uniform(-1/sqrt(H), 1/sqrt(H))."""
    I, H = num_sensors, hidden_units
    k = 1.0 / math.sqrt(H)
    keys = jax.random.split(key, 6)
    return {
        "w_ih": jax.random.uniform(keys[0], (4 * H, I), jnp.float32, -k, k),   # lstm.weight_ih_l0
        "w_hh": jax.random.uniform(keys[1], (4 * H, H), jnp.float32, -k, k),   # lstm.weight_hh_l0
        "b_ih": jax.random.uniform(keys[2], (4 * H,), jnp.float32, -k, k),     # lstm.bias_ih_l0
        "b_hh": jax.random.uniform(keys[3], (4 * H,), jnp.float32, -k, k),     # lstm.bias_hh_l0
        "w_lin": jax.random.uniform(keys[4], (1, H), jnp.float32, -k, k),      # linear.weight
        "b_lin": jax.random.uniform(keys[5], (1,), jnp.float32, -k, k),        # linear.bias
    }


def pack_params(tp):
    """Repack PyTorch-layout LSTM params for the kernel (gate order i,f,o,g; fused bias).

    Weights feeding the MXU are stored bf16 (equivalent to default-precision f32 matmuls,
    which already round operands to bf16); biases / head stay f32.
    """
    H = tp["w_hh"].shape[1]

    def reorder(w):  # rows are 4 gate blocks of size H in PyTorch order (i, f, g, o)
        return jnp.concatenate(
            [w[0:H], w[H:2 * H], w[3 * H:4 * H], w[2 * H:3 * H]], axis=0)

    return {
        "wih_t": reorder(tp["w_ih"]).T.astype(jnp.bfloat16),                  # (I, 4H)
        "whh_t": reorder(tp["w_hh"]).T.astype(jnp.bfloat16),                  # (H, 4H)
        "b": reorder(tp["b_ih"] + tp["b_hh"]).reshape(1, 4 * H).astype(jnp.float32),
        "wlin_row": tp["w_lin"].astype(jnp.float32),                          # (1, H)
        "blin": tp["b_lin"].reshape(1, 1).astype(jnp.float32),                # (1, 1)
    }


def _reference_forward(x, tp):
    """Pure-JAX reference matching the PyTorch module (gate order i, f, g, o)."""
    B, T, _ = x.shape
    H = tp["w_hh"].shape[1]
    b = tp["b_ih"] + tp["b_hh"]
    h = jnp.zeros((B, H), jnp.float32)
    c = jnp.zeros((B, H), jnp.float32)
    for t in range(T):
        g = x[:, t, :] @ tp["w_ih"].T + h @ tp["w_hh"].T + b
        i_g = jax.nn.sigmoid(g[:, :H])
        f_g = jax.nn.sigmoid(g[:, H:2 * H])
        g_g = jnp.tanh(g[:, 2 * H:3 * H])
        o_g = jax.nn.sigmoid(g[:, 3 * H:])
        c = f_g * c + i_g * g_g
        h = o_g * jnp.tanh(c)
    out = h @ tp["w_lin"].T + tp["b_lin"]
    return jax.nn.sigmoid(out.reshape(-1))


if __name__ == "__main__":
    B, T, NUM_SENSORS, HIDDEN = 2, 8, 4, 32

    key = jax.random.PRNGKey(0)
    kx, kp = jax.random.split(key)
    x = jax.random.normal(kx, (B, T, NUM_SENSORS), jnp.float32)
    torch_params = init_torch_like_params(kp, NUM_SENSORS, HIDDEN)
    params = pack_params(torch_params)

    out = shallow_regression_lstm(x, params)
    out = jax.block_until_ready(out)
    assert out.shape == (B,)
    assert bool(jnp.all(jnp.isfinite(out)))
    ref = _reference_forward(x, torch_params)
    # loose tolerance: matmuls run with bf16 operands (same as default-precision f32 MXU)
    assert bool(jnp.allclose(out, ref, atol=5e-3, rtol=5e-3))

    # Second config exercises multi-chunk state carry, masked time padding and batch padding.
    B2, T2 = 3, 10
    x2 = jax.random.normal(jax.random.PRNGKey(1), (B2, T2, NUM_SENSORS), jnp.float32)
    out2 = jax.block_until_ready(shallow_regression_lstm(x2, params, t_chunk=8))
    ref2 = _reference_forward(x2, torch_params)
    assert out2.shape == (B2,)
    assert bool(jnp.all(jnp.isfinite(out2)))
    assert bool(jnp.allclose(out2, ref2, atol=5e-3, rtol=5e-3))

    print("KERNEL_OK")
</pallas_src>

<mosaic_0001>
module attributes {stable_mosaic.version = 11 : i64} {
  func.func @_lstm_fused_kernel(%arg0: i32, %arg1: i32, %arg2: memref<16x8x4xbf16, #tpu.memory_space<vmem>>, %arg3: memref<4x128xbf16, #tpu.memory_space<vmem>>, %arg4: memref<32x128xbf16, #tpu.memory_space<vmem>>, %arg5: memref<1x128xf32, #tpu.memory_space<vmem>>, %arg6: memref<1x32xf32, #tpu.memory_space<vmem>>, %arg7: memref<1x1xf32, #tpu.memory_space<smem>>, %arg8: memref<1x16xf32, #tpu.memory_space<vmem>>, %arg9: memref<16x32xf32, #tpu.memory_space<vmem>>, %arg10: memref<16x32xf32, #tpu.memory_space<vmem>>) attributes {dimension_semantics = [#tpu.dimension_semantics<parallel>, #tpu.dimension_semantics<arbitrary>], iteration_bounds = array<i64: 1, 1>, scalar_prefetch = 0 : i64, scratch_operands = 2 : i64, tpu.core_type = #tpu.core_type<tc>, window_params = [{transform_indices = @transform_0, window_bounds = array<i64: 16, 8, 4>}, {pipeline_mode = #tpu.pipeline_mode<synchronous>, transform_indices = @transform_1, window_bounds = array<i64: 4, 128>}, {pipeline_mode = #tpu.pipeline_mode<synchronous>, transform_indices = @transform_2, window_bounds = array<i64: 32, 128>}, {pipeline_mode = #tpu.pipeline_mode<synchronous>, transform_indices = @transform_3, window_bounds = array<i64: 1, 128>}, {pipeline_mode = #tpu.pipeline_mode<synchronous>, transform_indices = @transform_4, window_bounds = array<i64: 1, 32>}, {transform_indices = @transform_5, window_bounds = array<i64: 1, 1>}, {transform_indices = @transform_6, window_bounds = array<i64: 1, 16>}]} {
    %c0_i32 = arith.constant 0 : i32
    %0 = arith.cmpi eq, %arg1, %c0_i32 : i32
    %1 = arith.extui %0 : i1 to i32
    %c0_i32_0 = arith.constant 0 : i32
    %2 = arith.cmpi ne, %1, %c0_i32_0 : i32
    scf.if %2 {
      %cst_79 = arith.constant 0.000000e+00 : f32
      %377 = vector.broadcast %cst_79 : f32 to vector<16x32xf32>
      %c0_80 = arith.constant 0 : index
      %c0_81 = arith.constant 0 : index
      %378 = vector.load %arg9[%c0_80, %c0_81] : memref<16x32xf32, #tpu.memory_space<vmem>>, vector<16x32xf32>
      tpu.vector_store %arg9[%c0_80, %c0_81], %377 {strides = array<i32>} : memref<16x32xf32, #tpu.memory_space<vmem>>, vector<16x32xf32>,
      %cst_82 = arith.constant 0.000000e+00 : f32
      %379 = vector.broadcast %cst_82 : f32 to vector<16x32xf32>
      %c0_83 = arith.constant 0 : index
      %c0_84 = arith.constant 0 : index
      %380 = vector.load %arg10[%c0_83, %c0_84] : memref<16x32xf32, #tpu.memory_space<vmem>>, vector<16x32xf32>
      tpu.vector_store %arg10[%c0_83, %c0_84], %379 {strides = array<i32>} : memref<16x32xf32, #tpu.memory_space<vmem>>, vector<16x32xf32>,
    } else {
    }
    %c0 = arith.constant 0 : index
    %c0_1 = arith.constant 0 : index
    %3 = vector.load %arg3[%c0, %c0_1] : memref<4x128xbf16, #tpu.memory_space<vmem>>, vector<4x128xbf16>
    %c0_2 = arith.constant 0 : index
    %c0_3 = arith.constant 0 : index
    %4 = vector.load %arg4[%c0_2, %c0_3] : memref<32x128xbf16, #tpu.memory_space<vmem>>, vector<32x128xbf16>
    %c0_4 = arith.constant 0 : index
    %c0_5 = arith.constant 0 : index
    %5 = vector.load %arg5[%c0_4, %c0_5] : memref<1x128xf32, #tpu.memory_space<vmem>>, vector<1x128xf32>
    %c0_6 = arith.constant 0 : index
    %c0_7 = arith.constant 0 : index
    %6 = vector.load %arg9[%c0_6, %c0_7] : memref<16x32xf32, #tpu.memory_space<vmem>>, vector<8x32xf32>
    %c0_8 = arith.constant 0 : index
    %c0_9 = arith.constant 0 : index
    %7 = vector.load %arg10[%c0_8, %c0_9] : memref<16x32xf32, #tpu.memory_space<vmem>>, vector<8x32xf32>
    %c8 = arith.constant 8 : index
    %c0_10 = arith.constant 0 : index
    %8 = vector.load %arg9[%c8, %c0_10] : memref<16x32xf32, #tpu.memory_space<vmem>>, vector<8x32xf32>
    %c8_11 = arith.constant 8 : index
    %c0_12 = arith.constant 0 : index
    %9 = vector.load %arg10[%c8_11, %c0_12] : memref<16x32xf32, #tpu.memory_space<vmem>>, vector<8x32xf32>
    %c0_13 = arith.constant 0 : index
    %c0_14 = arith.constant 0 : index
    %c0_15 = arith.constant 0 : index
    %10 = vector.load %arg2[%c0_13, %c0_14, %c0_15] : memref<16x8x4xbf16, #tpu.memory_space<vmem>>, vector<16x1x4xbf16>
    %11 = vector.shape_cast %10 : vector<16x1x4xbf16> to vector<16x4xbf16>
    %cst = arith.constant dense<0.000000e+00> : vector<16x128xf32>
    %12 = tpu.matmul %11, %3, %cst {dimension_numbers = #tpu.dot_dimension_numbers<[1], [0], [0], [1], [0, 0, 1, 1], [], []>} : vector<16x4xbf16>, vector<4x128xbf16>, vector<16x128xf32> -> vector<16x128xf32>
    %13 = vector.broadcast %5 : vector<1x128xf32> to vector<16x128xf32>
    %14 = arith.addf %12, %13 : vector<16x128xf32>
    %15 = vector.extract_strided_slice %14 {offsets = [0, 0], sizes = [8, 128], strides = [1, 1]} : vector<16x128xf32> to vector<8x128xf32>
    %16 = arith.truncf %6 : vector<8x32xf32> to vector<8x32xbf16>
    %cst_16 = arith.constant dense<0.000000e+00> : vector<8x128xf32>
    %17 = tpu.matmul %16, %4, %cst_16 {dimension_numbers = #tpu.dot_dimension_numbers<[1], [0], [0], [1], [0, 0, 1, 1], [], []>} : vector<8x32xbf16>, vector<32x128xbf16>, vector<8x128xf32> -> vector<8x128xf32>
    %18 = arith.addf %15, %17 : vector<8x128xf32>
    %19 = vector.extract_strided_slice %18 {offsets = [0, 0], sizes = [8, 96], strides = [1, 1]} : vector<8x128xf32> to vector<8x96xf32>
    %20 = arith.negf %19 : vector<8x96xf32>
    %21 = math.exp %20 : vector<8x96xf32>
    %cst_17 = arith.constant 1.000000e+00 : f32
    %22 = vector.broadcast %cst_17 : f32 to vector<8x96xf32>
    %23 = arith.addf %22, %21 : vector<8x96xf32>
    %24 = arith.divf %22, %23 : vector<8x96xf32>
    %25 = vector.extract_strided_slice %18 {offsets = [0, 96], sizes = [8, 32], strides = [1, 1]} : vector<8x128xf32> to vector<8x32xf32>
    %26 = math.tanh %25 : vector<8x32xf32>
    %27 = vector.extract_strided_slice %24 {offsets = [0, 32], sizes = [8, 32], strides = [1, 1]} : vector<8x96xf32> to vector<8x32xf32>
    %28 = arith.mulf %27, %7 : vector<8x32xf32>
    %29 = vector.extract_strided_slice %24 {offsets = [0, 0], sizes = [8, 32], strides = [1, 1]} : vector<8x96xf32> to vector<8x32xf32>
    %30 = arith.mulf %29, %26 : vector<8x32xf32>
    %31 = arith.addf %28, %30 : vector<8x32xf32>
    %32 = vector.extract_strided_slice %24 {offsets = [0, 64], sizes = [8, 32], strides = [1, 1]} : vector<8x96xf32> to vector<8x32xf32>
    %33 = math.tanh %31 : vector<8x32xf32>
    %34 = arith.mulf %32, %33 : vector<8x32xf32>
    %35 = vector.extract_strided_slice %14 {offsets = [8, 0], sizes = [8, 128], strides = [1, 1]} : vector<16x128xf32> to vector<8x128xf32>
    %36 = arith.truncf %8 : vector<8x32xf32> to vector<8x32xbf16>
    %cst_18 = arith.constant dense<0.000000e+00> : vector<8x128xf32>
    %37 = tpu.matmul %36, %4, %cst_18 {dimension_numbers = #tpu.dot_dimension_numbers<[1], [0], [0], [1], [0, 0, 1, 1], [], []>} : vector<8x32xbf16>, vector<32x128xbf16>, vector<8x128xf32> -> vector<8x128xf32>
    %38 = arith.addf %35, %37 : vector<8x128xf32>
    %39 = vector.extract_strided_slice %38 {offsets = [0, 0], sizes = [8, 96], strides = [1, 1]} : vector<8x128xf32> to vector<8x96xf32>
    %40 = arith.negf %39 : vector<8x96xf32>
    %41 = math.exp %40 : vector<8x96xf32>
    %cst_19 = arith.constant 1.000000e+00 : f32
    %42 = vector.broadcast %cst_19 : f32 to vector<8x96xf32>
    %43 = arith.addf %42, %41 : vector<8x96xf32>
    %44 = arith.divf %42, %43 : vector<8x96xf32>
    %45 = vector.extract_strided_slice %38 {offsets = [0, 96], sizes = [8, 32], strides = [1, 1]} : vector<8x128xf32> to vector<8x32xf32>
    %46 = math.tanh %45 : vector<8x32xf32>
    %47 = vector.extract_strided_slice %44 {offsets = [0, 32], sizes = [8, 32], strides = [1, 1]} : vector<8x96xf32> to vector<8x32xf32>
    %48 = arith.mulf %47, %9 : vector<8x32xf32>
    %49 = vector.extract_strided_slice %44 {offsets = [0, 0], sizes = [8, 32], strides = [1, 1]} : vector<8x96xf32> to vector<8x32xf32>
    %50 = arith.mulf %49, %46 : vector<8x32xf32>
    %51 = arith.addf %48, %50 : vector<8x32xf32>
    %52 = vector.extract_strided_slice %44 {offsets = [0, 64], sizes = [8, 32], strides = [1, 1]} : vector<8x96xf32> to vector<8x32xf32>
    %53 = math.tanh %51 : vector<8x32xf32>
    %54 = arith.mulf %52, %53 : vector<8x32xf32>
    %c0_20 = arith.constant 0 : index
    %c1 = arith.constant 1 : index
    %c0_21 = arith.constant 0 : index
    %55 = vector.load %arg2[%c0_20, %c1, %c0_21] : memref<16x8x4xbf16, #tpu.memory_space<vmem>>, vector<16x1x4xbf16>
    %56 = vector.shape_cast %55 : vector<16x1x4xbf16> to vector<16x4xbf16>
    %cst_22 = arith.constant dense<0.000000e+00> : vector<16x128xf32>
    %57 = tpu.matmul %56, %3, %cst_22 {dimension_numbers = #tpu.dot_dimension_numbers<[1], [0], [0], [1], [0, 0, 1, 1], [], []>} : vector<16x4xbf16>, vector<4x128xbf16>, vector<16x128xf32> -> vector<16x128xf32>
    %58 = vector.broadcast %5 : vector<1x128xf32> to vector<16x128xf32>
    %59 = arith.addf %57, %58 : vector<16x128xf32>
    %60 = vector.extract_strided_slice %59 {offsets = [0, 0], sizes = [8, 128], strides = [1, 1]} : vector<16x128xf32> to vector<8x128xf32>
    %61 = arith.truncf %34 : vector<8x32xf32> to vector<8x32xbf16>
    %cst_23 = arith.constant dense<0.000000e+00> : vector<8x128xf32>
    %62 = tpu.matmul %61, %4, %cst_23 {dimension_numbers = #tpu.dot_dimension_numbers<[1], [0], [0], [1], [0, 0, 1, 1], [], []>} : vector<8x32xbf16>, vector<32x128xbf16>, vector<8x128xf32> -> vector<8x128xf32>
    %63 = arith.addf %60, %62 : vector<8x128xf32>
    %64 = vector.extract_strided_slice %63 {offsets = [0, 0], sizes = [8, 96], strides = [1, 1]} : vector<8x128xf32> to vector<8x96xf32>
    %65 = arith.negf %64 : vector<8x96xf32>
    %66 = math.exp %65 : vector<8x96xf32>
    %cst_24 = arith.constant 1.000000e+00 : f32
    %67 = vector.broadcast %cst_24 : f32 to vector<8x96xf32>
    %68 = arith.addf %67, %66 : vector<8x96xf32>
    %69 = arith.divf %67, %68 : vector<8x96xf32>
    %70 = vector.extract_strided_slice %63 {offsets = [0, 96], sizes = [8, 32], strides = [1, 1]} : vector<8x128xf32> to vector<8x32xf32>
    %71 = math.tanh %70 : vector<8x32xf32>
    %72 = vector.extract_strided_slice %69 {offsets = [0, 32], sizes = [8, 32], strides = [1, 1]} : vector<8x96xf32> to vector<8x32xf32>
    %73 = arith.mulf %72, %31 : vector<8x32xf32>
    %74 = vector.extract_strided_slice %69 {offsets = [0, 0], sizes = [8, 32], strides = [1, 1]} : vector<8x96xf32> to vector<8x32xf32>
    %75 = arith.mulf %74, %71 : vector<8x32xf32>
    %76 = arith.addf %73, %75 : vector<8x32xf32>
    %77 = vector.extract_strided_slice %69 {offsets = [0, 64], sizes = [8, 32], strides = [1, 1]} : vector<8x96xf32> to vector<8x32xf32>
    %78 = math.tanh %76 : vector<8x32xf32>
    %79 = arith.mulf %77, %78 : vector<8x32xf32>
    %80 = vector.extract_strided_slice %59 {offsets = [8, 0], sizes = [8, 128], strides = [1, 1]} : vector<16x128xf32> to vector<8x128xf32>
    %81 = arith.truncf %54 : vector<8x32xf32> to vector<8x32xbf16>
    %cst_25 = arith.constant dense<0.000000e+00> : vector<8x128xf32>
    %82 = tpu.matmul %81, %4, %cst_25 {dimension_numbers = #tpu.dot_dimension_numbers<[1], [0], [0], [1], [0, 0, 1, 1], [], []>} : vector<8x32xbf16>, vector<32x128xbf16>, vector<8x128xf32> -> vector<8x128xf32>
    %83 = arith.addf %80, %82 : vector<8x128xf32>
    %84 = vector.extract_strided_slice %83 {offsets = [0, 0], sizes = [8, 96], strides = [1, 1]} : vector<8x128xf32> to vector<8x96xf32>
    %85 = arith.negf %84 : vector<8x96xf32>
    %86 = math.exp %85 : vector<8x96xf32>
    %cst_26 = arith.constant 1.000000e+00 : f32
    %87 = vector.broadcast %cst_26 : f32 to vector<8x96xf32>
    %88 = arith.addf %87, %86 : vector<8x96xf32>
    %89 = arith.divf %87, %88 : vector<8x96xf32>
    %90 = vector.extract_strided_slice %83 {offsets = [0, 96], sizes = [8, 32], strides = [1, 1]} : vector<8x128xf32> to vector<8x32xf32>
    %91 = math.tanh %90 : vector<8x32xf32>
    %92 = vector.extract_strided_slice %89 {offsets = [0, 32], sizes = [8, 32], strides = [1, 1]} : vector<8x96xf32> to vector<8x32xf32>
    %93 = arith.mulf %92, %51 : vector<8x32xf32>
    %94 = vector.extract_strided_slice %89 {offsets = [0, 0], sizes = [8, 32], strides = [1, 1]} : vector<8x96xf32> to vector<8x32xf32>
    %95 = arith.mulf %94, %91 : vector<8x32xf32>
    %96 = arith.addf %93, %95 : vector<8x32xf32>
    %97 = vector.extract_strided_slice %89 {offsets = [0, 64], sizes = [8, 32], strides = [1, 1]} : vector<8x96xf32> to vector<8x32xf32>
    %98 = math.tanh %96 : vector<8x32xf32>
    %99 = arith.mulf %97, %98 : vector<8x32xf32>
    %c0_27 = arith.constant 0 : index
    %c2 = arith.constant 2 : index
    %c0_28 = arith.constant 0 : index
    %100 = vector.load %arg2[%c0_27, %c2, %c0_28] : memref<16x8x4xbf16, #tpu.memory_space<vmem>>, vector<16x1x4xbf16>
    %101 = vector.shape_cast %100 : vector<16x1x4xbf16> to vector<16x4xbf16>
    %cst_29 = arith.constant dense<0.000000e+00> : vector<16x128xf32>
    %102 = tpu.matmul %101, %3, %cst_29 {dimension_numbers = #tpu.dot_dimension_numbers<[1], [0], [0], [1], [0, 0, 1, 1], [], []>} : vector<16x4xbf16>, vector<4x128xbf16>, vector<16x128xf32> -> vector<16x128xf32>
    %103 = vector.broadcast %5 : vector<1x128xf32> to vector<16x128xf32>
    %104 = arith.addf %102, %103 : vector<16x128xf32>
    %105 = vector.extract_strided_slice %104 {offsets = [0, 0], sizes = [8, 128], strides = [1, 1]} : vector<16x128xf32> to vector<8x128xf32>
    %106 = arith.truncf %79 : vector<8x32xf32> to vector<8x32xbf16>
    %cst_30 = arith.constant dense<0.000000e+00> : vector<8x128xf32>
    %107 = tpu.matmul %106, %4, %cst_30 {dimension_numbers = #tpu.dot_dimension_numbers<[1], [0], [0], [1], [0, 0, 1, 1], [], []>} : vector<8x32xbf16>, vector<32x128xbf16>, vector<8x128xf32> -> vector<8x128xf32>
    %108 = arith.addf %105, %107 : vector<8x128xf32>
    %109 = vector.extract_strided_slice %108 {offsets = [0, 0], sizes = [8, 96], strides = [1, 1]} : vector<8x128xf32> to vector<8x96xf32>
    %110 = arith.negf %109 : vector<8x96xf32>
    %111 = math.exp %110 : vector<8x96xf32>
    %cst_31 = arith.constant 1.000000e+00 : f32
    %112 = vector.broadcast %cst_31 : f32 to vector<8x96xf32>
    %113 = arith.addf %112, %111 : vector<8x96xf32>
    %114 = arith.divf %112, %113 : vector<8x96xf32>
    %115 = vector.extract_strided_slice %108 {offsets = [0, 96], sizes = [8, 32], strides = [1, 1]} : vector<8x128xf32> to vector<8x32xf32>
    %116 = math.tanh %115 : vector<8x32xf32>
    %117 = vector.extract_strided_slice %114 {offsets = [0, 32], sizes = [8, 32], strides = [1, 1]} : vector<8x96xf32> to vector<8x32xf32>
    %118 = arith.mulf %117, %76 : vector<8x32xf32>
    %119 = vector.extract_strided_slice %114 {offsets = [0, 0], sizes = [8, 32], strides = [1, 1]} : vector<8x96xf32> to vector<8x32xf32>
    %120 = arith.mulf %119, %116 : vector<8x32xf32>
    %121 = arith.addf %118, %120 : vector<8x32xf32>
    %122 = vector.extract_strided_slice %114 {offsets = [0, 64], sizes = [8, 32], strides = [1, 1]} : vector<8x96xf32> to vector<8x32xf32>
    %123 = math.tanh %121 : vector<8x32xf32>
    %124 = arith.mulf %122, %123 : vector<8x32xf32>
    %125 = vector.extract_strided_slice %104 {offsets = [8, 0], sizes = [8, 128], strides = [1, 1]} : vector<16x128xf32> to vector<8x128xf32>
    %126 = arith.truncf %99 : vector<8x32xf32> to vector<8x32xbf16>
    %cst_32 = arith.constant dense<0.000000e+00> : vector<8x128xf32>
    %127 = tpu.matmul %126, %4, %cst_32 {dimension_numbers = #tpu.dot_dimension_numbers<[1], [0], [0], [1], [0, 0, 1, 1], [], []>} : vector<8x32xbf16>, vector<32x128xbf16>, vector<8x128xf32> -> vector<8x128xf32>
    %128 = arith.addf %125, %127 : vector<8x128xf32>
    %129 = vector.extract_strided_slice %128 {offsets = [0, 0], sizes = [8, 96], strides = [1, 1]} : vector<8x128xf32> to vector<8x96xf32>
    %130 = arith.negf %129 : vector<8x96xf32>
    %131 = math.exp %130 : vector<8x96xf32>
    %cst_33 = arith.constant 1.000000e+00 : f32
    %132 = vector.broadcast %cst_33 : f32 to vector<8x96xf32>
    %133 = arith.addf %132, %131 : vector<8x96xf32>
    %134 = arith.divf %132, %133 : vector<8x96xf32>
    %135 = vector.extract_strided_slice %128 {offsets = [0, 96], sizes = [8, 32], strides = [1, 1]} : vector<8x128xf32> to vector<8x32xf32>
    %136 = math.tanh %135 : vector<8x32xf32>
    %137 = vector.extract_strided_slice %134 {offsets = [0, 32], sizes = [8, 32], strides = [1, 1]} : vector<8x96xf32> to vector<8x32xf32>
    %138 = arith.mulf %137, %96 : vector<8x32xf32>
    %139 = vector.extract_strided_slice %134 {offsets = [0, 0], sizes = [8, 32], strides = [1, 1]} : vector<8x96xf32> to vector<8x32xf32>
    %140 = arith.mulf %139, %136 : vector<8x32xf32>
    %141 = arith.addf %138, %140 : vector<8x32xf32>
    %142 = vector.extract_strided_slice %134 {offsets = [0, 64], sizes = [8, 32], strides = [1, 1]} : vector<8x96xf32> to vector<8x32xf32>
    %143 = math.tanh %141 : vector<8x32xf32>
    %144 = arith.mulf %142, %143 : vector<8x32xf32>
    %c0_34 = arith.constant 0 : index
    %c3 = arith.constant 3 : index
    %c0_35 = arith.constant 0 : index
    %145 = vector.load %arg2[%c0_34, %c3, %c0_35] : memref<16x8x4xbf16, #tpu.memory_space<vmem>>, vector<16x1x4xbf16>
    %146 = vector.shape_cast %145 : vector<16x1x4xbf16> to vector<16x4xbf16>
    %cst_36 = arith.constant dense<0.000000e+00> : vector<16x128xf32>
    %147 = tpu.matmul %146, %3, %cst_36 {dimension_numbers = #tpu.dot_dimension_numbers<[1], [0], [0], [1], [0, 0, 1, 1], [], []>} : vector<16x4xbf16>, vector<4x128xbf16>, vector<16x128xf32> -> vector<16x128xf32>
    %148 = vector.broadcast %5 : vector<1x128xf32> to vector<16x128xf32>
    %149 = arith.addf %147, %148 : vector<16x128xf32>
    %150 = vector.extract_strided_slice %149 {offsets = [0, 0], sizes = [8, 128], strides = [1, 1]} : vector<16x128xf32> to vector<8x128xf32>
    %151 = arith.truncf %124 : vector<8x32xf32> to vector<8x32xbf16>
    %cst_37 = arith.constant dense<0.000000e+00> : vector<8x128xf32>
    %152 = tpu.matmul %151, %4, %cst_37 {dimension_numbers = #tpu.dot_dimension_numbers<[1], [0], [0], [1], [0, 0, 1, 1], [], []>} : vector<8x32xbf16>, vector<32x128xbf16>, vector<8x128xf32> -> vector<8x128xf32>
    %153 = arith.addf %150, %152 : vector<8x128xf32>
    %154 = vector.extract_strided_slice %153 {offsets = [0, 0], sizes = [8, 96], strides = [1, 1]} : vector<8x128xf32> to vector<8x96xf32>
    %155 = arith.negf %154 : vector<8x96xf32>
    %156 = math.exp %155 : vector<8x96xf32>
    %cst_38 = arith.constant 1.000000e+00 : f32
    %157 = vector.broadcast %cst_38 : f32 to vector<8x96xf32>
    %158 = arith.addf %157, %156 : vector<8x96xf32>
    %159 = arith.divf %157, %158 : vector<8x96xf32>
    %160 = vector.extract_strided_slice %153 {offsets = [0, 96], sizes = [8, 32], strides = [1, 1]} : vector<8x128xf32> to vector<8x32xf32>
    %161 = math.tanh %160 : vector<8x32xf32>
    %162 = vector.extract_strided_slice %159 {offsets = [0, 32], sizes = [8, 32], strides = [1, 1]} : vector<8x96xf32> to vector<8x32xf32>
    %163 = arith.mulf %162, %121 : vector<8x32xf32>
    %164 = vector.extract_strided_slice %159 {offsets = [0, 0], sizes = [8, 32], strides = [1, 1]} : vector<8x96xf32> to vector<8x32xf32>
    %165 = arith.mulf %164, %161 : vector<8x32xf32>
    %166 = arith.addf %163, %165 : vector<8x32xf32>
    %167 = vector.extract_strided_slice %159 {offsets = [0, 64], sizes = [8, 32], strides = [1, 1]} : vector<8x96xf32> to vector<8x32xf32>
    %168 = math.tanh %166 : vector<8x32xf32>
    %169 = arith.mulf %167, %168 : vector<8x32xf32>
    %170 = vector.extract_strided_slice %149 {offsets = [8, 0], sizes = [8, 128], strides = [1, 1]} : vector<16x128xf32> to vector<8x128xf32>
    %171 = arith.truncf %144 : vector<8x32xf32> to vector<8x32xbf16>
    %cst_39 = arith.constant dense<0.000000e+00> : vector<8x128xf32>
    %172 = tpu.matmul %171, %4, %cst_39 {dimension_numbers = #tpu.dot_dimension_numbers<[1], [0], [0], [1], [0, 0, 1, 1], [], []>} : vector<8x32xbf16>, vector<32x128xbf16>, vector<8x128xf32> -> vector<8x128xf32>
    %173 = arith.addf %170, %172 : vector<8x128xf32>
    %174 = vector.extract_strided_slice %173 {offsets = [0, 0], sizes = [8, 96], strides = [1, 1]} : vector<8x128xf32> to vector<8x96xf32>
    %175 = arith.negf %174 : vector<8x96xf32>
    %176 = math.exp %175 : vector<8x96xf32>
    %cst_40 = arith.constant 1.000000e+00 : f32
    %177 = vector.broadcast %cst_40 : f32 to vector<8x96xf32>
    %178 = arith.addf %177, %176 : vector<8x96xf32>
    %179 = arith.divf %177, %178 : vector<8x96xf32>
    %180 = vector.extract_strided_slice %173 {offsets = [0, 96], sizes = [8, 32], strides = [1, 1]} : vector<8x128xf32> to vector<8x32xf32>
    %181 = math.tanh %180 : vector<8x32xf32>
    %182 = vector.extract_strided_slice %179 {offsets = [0, 32], sizes = [8, 32], strides = [1, 1]} : vector<8x96xf32> to vector<8x32xf32>
    %183 = arith.mulf %182, %141 : vector<8x32xf32>
    %184 = vector.extract_strided_slice %179 {offsets = [0, 0], sizes = [8, 32], strides = [1, 1]} : vector<8x96xf32> to vector<8x32xf32>
    %185 = arith.mulf %184, %181 : vector<8x32xf32>
    %186 = arith.addf %183, %185 : vector<8x32xf32>
    %187 = vector.extract_strided_slice %179 {offsets = [0, 64], sizes = [8, 32], strides = [1, 1]} : vector<8x96xf32> to vector<8x32xf32>
    %188 = math.tanh %186 : vector<8x32xf32>
    %189 = arith.mulf %187, %188 : vector<8x32xf32>
    %c0_41 = arith.constant 0 : index
    %c4 = arith.constant 4 : index
    %c0_42 = arith.constant 0 : index
    %190 = vector.load %arg2[%c0_41, %c4, %c0_42] : memref<16x8x4xbf16, #tpu.memory_space<vmem>>, vector<16x1x4xbf16>
    %191 = vector.shape_cast %190 : vector<16x1x4xbf16> to vector<16x4xbf16>
    %cst_43 = arith.constant dense<0.000000e+00> : vector<16x128xf32>
    %192 = tpu.matmul %191, %3, %cst_43 {dimension_numbers = #tpu.dot_dimension_numbers<[1], [0], [0], [1], [0, 0, 1, 1], [], []>} : vector<16x4xbf16>, vector<4x128xbf16>, vector<16x128xf32> -> vector<16x128xf32>
    %193 = vector.broadcast %5 : vector<1x128xf32> to vector<16x128xf32>
    %194 = arith.addf %192, %193 : vector<16x128xf32>
    %195 = vector.extract_strided_slice %194 {offsets = [0, 0], sizes = [8, 128], strides = [1, 1]} : vector<16x128xf32> to vector<8x128xf32>
    %196 = arith.truncf %169 : vector<8x32xf32> to vector<8x32xbf16>
    %cst_44 = arith.constant dense<0.000000e+00> : vector<8x128xf32>
    %197 = tpu.matmul %196, %4, %cst_44 {dimension_numbers = #tpu.dot_dimension_numbers<[1], [0], [0], [1], [0, 0, 1, 1], [], []>} : vector<8x32xbf16>, vector<32x128xbf16>, vector<8x128xf32> -> vector<8x128xf32>
    %198 = arith.addf %195, %197 : vector<8x128xf32>
    %199 = vector.extract_strided_slice %198 {offsets = [0, 0], sizes = [8, 96], strides = [1, 1]} : vector<8x128xf32> to vector<8x96xf32>
    %200 = arith.negf %199 : vector<8x96xf32>
    %201 = math.exp %200 : vector<8x96xf32>
    %cst_45 = arith.constant 1.000000e+00 : f32
    %202 = vector.broadcast %cst_45 : f32 to vector<8x96xf32>
    %203 = arith.addf %202, %201 : vector<8x96xf32>
    %204 = arith.divf %202, %203 : vector<8x96xf32>
    %205 = vector.extract_strided_slice %198 {offsets = [0, 96], sizes = [8, 32], strides = [1, 1]} : vector<8x128xf32> to vector<8x32xf32>
    %206 = math.tanh %205 : vector<8x32xf32>
    %207 = vector.extract_strided_slice %204 {offsets = [0, 32], sizes = [8, 32], strides = [1, 1]} : vector<8x96xf32> to vector<8x32xf32>
    %208 = arith.mulf %207, %166 : vector<8x32xf32>
    %209 = vector.extract_strided_slice %204 {offsets = [0, 0], sizes = [8, 32], strides = [1, 1]} : vector<8x96xf32> to vector<8x32xf32>
    %210 = arith.mulf %209, %206 : vector<8x32xf32>
    %211 = arith.addf %208, %210 : vector<8x32xf32>
    %212 = vector.extract_strided_slice %204 {offsets = [0, 64], sizes = [8, 32], strides = [1, 1]} : vector<8x96xf32> to vector<8x32xf32>
    %213 = math.tanh %211 : vector<8x32xf32>
    %214 = arith.mulf %212, %213 : vector<8x32xf32>
    %215 = vector.extract_strided_slice %194 {offsets = [8, 0], sizes = [8, 128], strides = [1, 1]} : vector<16x128xf32> to vector<8x128xf32>
    %216 = arith.truncf %189 : vector<8x32xf32> to vector<8x32xbf16>
    %cst_46 = arith.constant dense<0.000000e+00> : vector<8x128xf32>
    %217 = tpu.matmul %216, %4, %cst_46 {dimension_numbers = #tpu.dot_dimension_numbers<[1], [0], [0], [1], [0, 0, 1, 1], [], []>} : vector<8x32xbf16>, vector<32x128xbf16>, vector<8x128xf32> -> vector<8x128xf32>
    %218 = arith.addf %215, %217 : vector<8x128xf32>
    %219 = vector.extract_strided_slice %218 {offsets = [0, 0], sizes = [8, 96], strides = [1, 1]} : vector<8x128xf32> to vector<8x96xf32>
    %220 = arith.negf %219 : vector<8x96xf32>
    %221 = math.exp %220 : vector<8x96xf32>
    %cst_47 = arith.constant 1.000000e+00 : f32
    %222 = vector.broadcast %cst_47 : f32 to vector<8x96xf32>
    %223 = arith.addf %222, %221 : vector<8x96xf32>
    %224 = arith.divf %222, %223 : vector<8x96xf32>
    %225 = vector.extract_strided_slice %218 {offsets = [0, 96], sizes = [8, 32], strides = [1, 1]} : vector<8x128xf32> to vector<8x32xf32>
    %226 = math.tanh %225 : vector<8x32xf32>
    %227 = vector.extract_strided_slice %224 {offsets = [0, 32], sizes = [8, 32], strides = [1, 1]} : vector<8x96xf32> to vector<8x32xf32>
    %228 = arith.mulf %227, %186 : vector<8x32xf32>
    %229 = vector.extract_strided_slice %224 {offsets = [0, 0], sizes = [8, 32], strides = [1, 1]} : vector<8x96xf32> to vector<8x32xf32>
    %230 = arith.mulf %229, %226 : vector<8x32xf32>
    %231 = arith.addf %228, %230 : vector<8x32xf32>
    %232 = vector.extract_strided_slice %224 {offsets = [0, 64], sizes = [8, 32], strides = [1, 1]} : vector<8x96xf32> to vector<8x32xf32>
    %233 = math.tanh %231 : vector<8x32xf32>
    %234 = arith.mulf %232, %233 : vector<8x32xf32>
    %c0_48 = arith.constant 0 : index
    %c5 = arith.constant 5 : index
    %c0_49 = arith.constant 0 : index
    %235 = vector.load %arg2[%c0_48, %c5, %c0_49] : memref<16x8x4xbf16, #tpu.memory_space<vmem>>, vector<16x1x4xbf16>
    %236 = vector.shape_cast %235 : vector<16x1x4xbf16> to vector<16x4xbf16>
    %cst_50 = arith.constant dense<0.000000e+00> : vector<16x128xf32>
    %237 = tpu.matmul %236, %3, %cst_50 {dimension_numbers = #tpu.dot_dimension_numbers<[1], [0], [0], [1], [0, 0, 1, 1], [], []>} : vector<16x4xbf16>, vector<4x128xbf16>, vector<16x128xf32> -> vector<16x128xf32>
    %238 = vector.broadcast %5 : vector<1x128xf32> to vector<16x128xf32>
    %239 = arith.addf %237, %238 : vector<16x128xf32>
    %240 = vector.extract_strided_slice %239 {offsets = [0, 0], sizes = [8, 128], strides = [1, 1]} : vector<16x128xf32> to vector<8x128xf32>
    %241 = arith.truncf %214 : vector<8x32xf32> to vector<8x32xbf16>
    %cst_51 = arith.constant dense<0.000000e+00> : vector<8x128xf32>
    %242 = tpu.matmul %241, %4, %cst_51 {dimension_numbers = #tpu.dot_dimension_numbers<[1], [0], [0], [1], [0, 0, 1, 1], [], []>} : vector<8x32xbf16>, vector<32x128xbf16>, vector<8x128xf32> -> vector<8x128xf32>
    %243 = arith.addf %240, %242 : vector<8x128xf32>
    %244 = vector.extract_strided_slice %243 {offsets = [0, 0], sizes = [8, 96], strides = [1, 1]} : vector<8x128xf32> to vector<8x96xf32>
    %245 = arith.negf %244 : vector<8x96xf32>
    %246 = math.exp %245 : vector<8x96xf32>
    %cst_52 = arith.constant 1.000000e+00 : f32
    %247 = vector.broadcast %cst_52 : f32 to vector<8x96xf32>
    %248 = arith.addf %247, %246 : vector<8x96xf32>
    %249 = arith.divf %247, %248 : vector<8x96xf32>
    %250 = vector.extract_strided_slice %243 {offsets = [0, 96], sizes = [8, 32], strides = [1, 1]} : vector<8x128xf32> to vector<8x32xf32>
    %251 = math.tanh %250 : vector<8x32xf32>
    %252 = vector.extract_strided_slice %249 {offsets = [0, 32], sizes = [8, 32], strides = [1, 1]} : vector<8x96xf32> to vector<8x32xf32>
    %253 = arith.mulf %252, %211 : vector<8x32xf32>
    %254 = vector.extract_strided_slice %249 {offsets = [0, 0], sizes = [8, 32], strides = [1, 1]} : vector<8x96xf32> to vector<8x32xf32>
    %255 = arith.mulf %254, %251 : vector<8x32xf32>
    %256 = arith.addf %253, %255 : vector<8x32xf32>
    %257 = vector.extract_strided_slice %249 {offsets = [0, 64], sizes = [8, 32], strides = [1, 1]} : vector<8x96xf32> to vector<8x32xf32>
    %258 = math.tanh %256 : vector<8x32xf32>
    %259 = arith.mulf %257, %258 : vector<8x32xf32>
    %260 = vector.extract_strided_slice %239 {offsets = [8, 0], sizes = [8, 128], strides = [1, 1]} : vector<16x128xf32> to vector<8x128xf32>
    %261 = arith.truncf %234 : vector<8x32xf32> to vector<8x32xbf16>
    %cst_53 = arith.constant dense<0.000000e+00> : vector<8x128xf32>
    %262 = tpu.matmul %261, %4, %cst_53 {dimension_numbers = #tpu.dot_dimension_numbers<[1], [0], [0], [1], [0, 0, 1, 1], [], []>} : vector<8x32xbf16>, vector<32x128xbf16>, vector<8x128xf32> -> vector<8x128xf32>
    %263 = arith.addf %260, %262 : vector<8x128xf32>
    %264 = vector.extract_strided_slice %263 {offsets = [0, 0], sizes = [8, 96], strides = [1, 1]} : vector<8x128xf32> to vector<8x96xf32>
    %265 = arith.negf %264 : vector<8x96xf32>
    %266 = math.exp %265 : vector<8x96xf32>
    %cst_54 = arith.constant 1.000000e+00 : f32
    %267 = vector.broadcast %cst_54 : f32 to vector<8x96xf32>
    %268 = arith.addf %267, %266 : vector<8x96xf32>
    %269 = arith.divf %267, %268 : vector<8x96xf32>
    %270 = vector.extract_strided_slice %263 {offsets = [0, 96], sizes = [8, 32], strides = [1, 1]} : vector<8x128xf32> to vector<8x32xf32>
    %271 = math.tanh %270 : vector<8x32xf32>
    %272 = vector.extract_strided_slice %269 {offsets = [0, 32], sizes = [8, 32], strides = [1, 1]} : vector<8x96xf32> to vector<8x32xf32>
    %273 = arith.mulf %272, %231 : vector<8x32xf32>
    %274 = vector.extract_strided_slice %269 {offsets = [0, 0], sizes = [8, 32], strides = [1, 1]} : vector<8x96xf32> to vector<8x32xf32>
    %275 = arith.mulf %274, %271 : vector<8x32xf32>
    %276 = arith.addf %273, %275 : vector<8x32xf32>
    %277 = vector.extract_strided_slice %269 {offsets = [0, 64], sizes = [8, 32], strides = [1, 1]} : vector<8x96xf32> to vector<8x32xf32>
    %278 = math.tanh %276 : vector<8x32xf32>
    %279 = arith.mulf %277, %278 : vector<8x32xf32>
    %c0_55 = arith.constant 0 : index
    %c6 = arith.constant 6 : index
    %c0_56 = arith.constant 0 : index
    %280 = vector.load %arg2[%c0_55, %c6, %c0_56] : memref<16x8x4xbf16, #tpu.memory_space<vmem>>, vector<16x1x4xbf16>
    %281 = vector.shape_cast %280 : vector<16x1x4xbf16> to vector<16x4xbf16>
    %cst_57 = arith.constant dense<0.000000e+00> : vector<16x128xf32>
    %282 = tpu.matmul %281, %3, %cst_57 {dimension_numbers = #tpu.dot_dimension_numbers<[1], [0], [0], [1], [0, 0, 1, 1], [], []>} : vector<16x4xbf16>, vector<4x128xbf16>, vector<16x128xf32> -> vector<16x128xf32>
    %283 = vector.broadcast %5 : vector<1x128xf32> to vector<16x128xf32>
    %284 = arith.addf %282, %283 : vector<16x128xf32>
    %285 = vector.extract_strided_slice %284 {offsets = [0, 0], sizes = [8, 128], strides = [1, 1]} : vector<16x128xf32> to vector<8x128xf32>
    %286 = arith.truncf %259 : vector<8x32xf32> to vector<8x32xbf16>
    %cst_58 = arith.constant dense<0.000000e+00> : vector<8x128xf32>
    %287 = tpu.matmul %286, %4, %cst_58 {dimension_numbers = #tpu.dot_dimension_numbers<[1], [0], [0], [1], [0, 0, 1, 1], [], []>} : vector<8x32xbf16>, vector<32x128xbf16>, vector<8x128xf32> -> vector<8x128xf32>
    %288 = arith.addf %285, %287 : vector<8x128xf32>
    %289 = vector.extract_strided_slice %288 {offsets = [0, 0], sizes = [8, 96], strides = [1, 1]} : vector<8x128xf32> to vector<8x96xf32>
    %290 = arith.negf %289 : vector<8x96xf32>
    %291 = math.exp %290 : vector<8x96xf32>
    %cst_59 = arith.constant 1.000000e+00 : f32
    %292 = vector.broadcast %cst_59 : f32 to vector<8x96xf32>
    %293 = arith.addf %292, %291 : vector<8x96xf32>
    %294 = arith.divf %292, %293 : vector<8x96xf32>
    %295 = vector.extract_strided_slice %288 {offsets = [0, 96], sizes = [8, 32], strides = [1, 1]} : vector<8x128xf32> to vector<8x32xf32>
    %296 = math.tanh %295 : vector<8x32xf32>
    %297 = vector.extract_strided_slice %294 {offsets = [0, 32], sizes = [8, 32], strides = [1, 1]} : vector<8x96xf32> to vector<8x32xf32>
    %298 = arith.mulf %297, %256 : vector<8x32xf32>
    %299 = vector.extract_strided_slice %294 {offsets = [0, 0], sizes = [8, 32], strides = [1, 1]} : vector<8x96xf32> to vector<8x32xf32>
    %300 = arith.mulf %299, %296 : vector<8x32xf32>
    %301 = arith.addf %298, %300 : vector<8x32xf32>
    %302 = vector.extract_strided_slice %294 {offsets = [0, 64], sizes = [8, 32], strides = [1, 1]} : vector<8x96xf32> to vector<8x32xf32>
    %303 = math.tanh %301 : vector<8x32xf32>
    %304 = arith.mulf %302, %303 : vector<8x32xf32>
    %305 = vector.extract_strided_slice %284 {offsets = [8, 0], sizes = [8, 128], strides = [1, 1]} : vector<16x128xf32> to vector<8x128xf32>
    %306 = arith.truncf %279 : vector<8x32xf32> to vector<8x32xbf16>
    %cst_60 = arith.constant dense<0.000000e+00> : vector<8x128xf32>
    %307 = tpu.matmul %306, %4, %cst_60 {dimension_numbers = #tpu.dot_dimension_numbers<[1], [0], [0], [1], [0, 0, 1, 1], [], []>} : vector<8x32xbf16>, vector<32x128xbf16>, vector<8x128xf32> -> vector<8x128xf32>
    %308 = arith.addf %305, %307 : vector<8x128xf32>
    %309 = vector.extract_strided_slice %308 {offsets = [0, 0], sizes = [8, 96], strides = [1, 1]} : vector<8x128xf32> to vector<8x96xf32>
    %310 = arith.negf %309 : vector<8x96xf32>
    %311 = math.exp %310 : vector<8x96xf32>
    %cst_61 = arith.constant 1.000000e+00 : f32
    %312 = vector.broadcast %cst_61 : f32 to vector<8x96xf32>
    %313 = arith.addf %312, %311 : vector<8x96xf32>
    %314 = arith.divf %312, %313 : vector<8x96xf32>
    %315 = vector.extract_strided_slice %308 {offsets = [0, 96], sizes = [8, 32], strides = [1, 1]} : vector<8x128xf32> to vector<8x32xf32>
    %316 = math.tanh %315 : vector<8x32xf32>
    %317 = vector.extract_strided_slice %314 {offsets = [0, 32], sizes = [8, 32], strides = [1, 1]} : vector<8x96xf32> to vector<8x32xf32>
    %318 = arith.mulf %317, %276 : vector<8x32xf32>
    %319 = vector.extract_strided_slice %314 {offsets = [0, 0], sizes = [8, 32], strides = [1, 1]} : vector<8x96xf32> to vector<8x32xf32>
    %320 = arith.mulf %319, %316 : vector<8x32xf32>
    %321 = arith.addf %318, %320 : vector<8x32xf32>
    %322 = vector.extract_strided_slice %314 {offsets = [0, 64], sizes = [8, 32], strides = [1, 1]} : vector<8x96xf32> to vector<8x32xf32>
    %323 = math.tanh %321 : vector<8x32xf32>
    %324 = arith.mulf %322, %323 : vector<8x32xf32>
    %c0_62 = arith.constant 0 : index
    %c7 = arith.constant 7 : index
    %c0_63 = arith.constant 0 : index
    %325 = vector.load %arg2[%c0_62, %c7, %c0_63] : memref<16x8x4xbf16, #tpu.memory_space<vmem>>, vector<16x1x4xbf16>
    %326 = vector.shape_cast %325 : vector<16x1x4xbf16> to vector<16x4xbf16>
    %cst_64 = arith.constant dense<0.000000e+00> : vector<16x128xf32>
    %327 = tpu.matmul %326, %3, %cst_64 {dimension_numbers = #tpu.dot_dimension_numbers<[1], [0], [0], [1], [0, 0, 1, 1], [], []>} : vector<16x4xbf16>, vector<4x128xbf16>, vector<16x128xf32> -> vector<16x128xf32>
    %328 = vector.broadcast %5 : vector<1x128xf32> to vector<16x128xf32>
    %329 = arith.addf %327, %328 : vector<16x128xf32>
    %330 = vector.extract_strided_slice %329 {offsets = [0, 0], sizes = [8, 128], strides = [1, 1]} : vector<16x128xf32> to vector<8x128xf32>
    %331 = arith.truncf %304 : vector<8x32xf32> to vector<8x32xbf16>
    %cst_65 = arith.constant dense<0.000000e+00> : vector<8x128xf32>
    %332 = tpu.matmul %331, %4, %cst_65 {dimension_numbers = #tpu.dot_dimension_numbers<[1], [0], [0], [1], [0, 0, 1, 1], [], []>} : vector<8x32xbf16>, vector<32x128xbf16>, vector<8x128xf32> -> vector<8x128xf32>
    %333 = arith.addf %330, %332 : vector<8x128xf32>
    %334 = vector.extract_strided_slice %333 {offsets = [0, 0], sizes = [8, 96], strides = [1, 1]} : vector<8x128xf32> to vector<8x96xf32>
    %335 = arith.negf %334 : vector<8x96xf32>
    %336 = math.exp %335 : vector<8x96xf32>
    %cst_66 = arith.constant 1.000000e+00 : f32
    %337 = vector.broadcast %cst_66 : f32 to vector<8x96xf32>
    %338 = arith.addf %337, %336 : vector<8x96xf32>
    %339 = arith.divf %337, %338 : vector<8x96xf32>
    %340 = vector.extract_strided_slice %333 {offsets = [0, 96], sizes = [8, 32], strides = [1, 1]} : vector<8x128xf32> to vector<8x32xf32>
    %341 = math.tanh %340 : vector<8x32xf32>
    %342 = vector.extract_strided_slice %339 {offsets = [0, 32], sizes = [8, 32], strides = [1, 1]} : vector<8x96xf32> to vector<8x32xf32>
    %343 = arith.mulf %342, %301 : vector<8x32xf32>
    %344 = vector.extract_strided_slice %339 {offsets = [0, 0], sizes = [8, 32], strides = [1, 1]} : vector<8x96xf32> to vector<8x32xf32>
    %345 = arith.mulf %344, %341 : vector<8x32xf32>
    %346 = arith.addf %343, %345 : vector<8x32xf32>
    %347 = vector.extract_strided_slice %339 {offsets = [0, 64], sizes = [8, 32], strides = [1, 1]} : vector<8x96xf32> to vector<8x32xf32>
    %348 = math.tanh %346 : vector<8x32xf32>
    %349 = arith.mulf %347, %348 : vector<8x32xf32>
    %350 = vector.extract_strided_slice %329 {offsets = [8, 0], sizes = [8, 128], strides = [1, 1]} : vector<16x128xf32> to vector<8x128xf32>
    %351 = arith.truncf %324 : vector<8x32xf32> to vector<8x32xbf16>
    %cst_67 = arith.constant dense<0.000000e+00> : vector<8x128xf32>
    %352 = tpu.matmul %351, %4, %cst_67 {dimension_numbers = #tpu.dot_dimension_numbers<[1], [0], [0], [1], [0, 0, 1, 1], [], []>} : vector<8x32xbf16>, vector<32x128xbf16>, vector<8x128xf32> -> vector<8x128xf32>
    %353 = arith.addf %350, %352 : vector<8x128xf32>
    %354 = vector.extract_strided_slice %353 {offsets = [0, 0], sizes = [8, 96], strides = [1, 1]} : vector<8x128xf32> to vector<8x96xf32>
    %355 = arith.negf %354 : vector<8x96xf32>
    %356 = math.exp %355 : vector<8x96xf32>
    %cst_68 = arith.constant 1.000000e+00 : f32
    %357 = vector.broadcast %cst_68 : f32 to vector<8x96xf32>
    %358 = arith.addf %357, %356 : vector<8x96xf32>
    %359 = arith.divf %357, %358 : vector<8x96xf32>
    %360 = vector.extract_strided_slice %353 {offsets = [0, 96], sizes = [8, 32], strides = [1, 1]} : vector<8x128xf32> to vector<8x32xf32>
    %361 = math.tanh %360 : vector<8x32xf32>
    %362 = vector.extract_strided_slice %359 {offsets = [0, 32], sizes = [8, 32], strides = [1, 1]} : vector<8x96xf32> to vector<8x32xf32>
    %363 = arith.mulf %362, %321 : vector<8x32xf32>
    %364 = vector.extract_strided_slice %359 {offsets = [0, 0], sizes = [8, 32], strides = [1, 1]} : vector<8x96xf32> to vector<8x32xf32>
    %365 = arith.mulf %364, %361 : vector<8x32xf32>
    %366 = arith.addf %363, %365 : vector<8x32xf32>
    %367 = vector.extract_strided_slice %359 {offsets = [0, 64], sizes = [8, 32], strides = [1, 1]} : vector<8x96xf32> to vector<8x32xf32>
    %368 = math.tanh %366 : vector<8x32xf32>
    %369 = arith.mulf %367, %368 : vector<8x32xf32>
    %c0_69 = arith.constant 0 : index
    %c0_70 = arith.constant 0 : index
    %370 = vector.load %arg9[%c0_69, %c0_70] : memref<16x32xf32, #tpu.memory_space<vmem>>, vector<8x32xf32>
    tpu.vector_store %arg9[%c0_69, %c0_70], %349 {strides = array<i32>} : memref<16x32xf32, #tpu.memory_space<vmem>>, vector<8x32xf32>,
    %c8_71 = arith.constant 8 : index
    %c0_72 = arith.constant 0 : index
    %371 = vector.load %arg9[%c8_71, %c0_72] : memref<16x32xf32, #tpu.memory_space<vmem>>, vector<8x32xf32>
    tpu.vector_store %arg9[%c8_71, %c0_72], %369 {strides = array<i32>} : memref<16x32xf32, #tpu.memory_space<vmem>>, vector<8x32xf32>,
    %c0_73 = arith.constant 0 : index
    %c0_74 = arith.constant 0 : index
    %372 = vector.load %arg10[%c0_73, %c0_74] : memref<16x32xf32, #tpu.memory_space<vmem>>, vector<8x32xf32>
    tpu.vector_store %arg10[%c0_73, %c0_74], %346 {strides = array<i32>} : memref<16x32xf32, #tpu.memory_space<vmem>>, vector<8x32xf32>,
    %c8_75 = arith.constant 8 : index
    %c0_76 = arith.constant 0 : index
    %373 = vector.load %arg10[%c8_75, %c0_76] : memref<16x32xf32, #tpu.memory_space<vmem>>, vector<8x32xf32>
    tpu.vector_store %arg10[%c8_75, %c0_76], %366 {strides = array<i32>} : memref<16x32xf32, #tpu.memory_space<vmem>>, vector<8x32xf32>,
    %c0_i32_77 = arith.constant 0 : i32
    %374 = arith.cmpi eq, %arg1, %c0_i32_77 : i32
    %375 = arith.extui %374 : i1 to i32
    %c0_i32_78 = arith.constant 0 : i32
    %376 = arith.cmpi ne, %375, %c0_i32_78 : i32
    scf.if %376 {
      %c0_79 = arith.constant 0 : index
      %c0_80 = arith.constant 0 : index
      %377 = vector.load %arg9[%c0_79, %c0_80] : memref<16x32xf32, #tpu.memory_space<vmem>>, vector<16x32xf32>
      %c0_81 = arith.constant 0 : index
      %c0_82 = arith.constant 0 : index
      %378 = vector.load %arg6[%c0_81, %c0_82] : memref<1x32xf32, #tpu.memory_space<vmem>>, vector<1x32xf32>
      %379 = vector.broadcast %378 : vector<1x32xf32> to vector<16x32xf32>
      %380 = arith.mulf %377, %379 : vector<16x32xf32>
      %cst_83 = arith.constant dense<0.000000e+00> : vector<16xf32>
      %381 = vector.multi_reduction <add>, %380, %cst_83 [1] : vector<16x32xf32> to vector<16xf32>
      %c0_84 = arith.constant 0 : index
      %c0_85 = arith.constant 0 : index
      %382 = memref.load %arg7[%c0_84, %c0_85] : memref<1x1xf32, #tpu.memory_space<smem>>
      %383 = vector.broadcast %382 : f32 to vector<16xf32>
      %384 = arith.addf %381, %383 : vector<16xf32>
      %385 = arith.negf %384 : vector<16xf32>
      %386 = math.exp %385 : vector<16xf32>
      %cst_86 = arith.constant 1.000000e+00 : f32
      %387 = vector.broadcast %cst_86 : f32 to vector<16xf32>
      %388 = arith.addf %387, %386 : vector<16xf32>
      %389 = arith.divf %387, %388 : vector<16xf32>
      %390 = vector.shape_cast %389 : vector<16xf32> to vector<1x16xf32>
      %c0_87 = arith.constant 0 : index
      %c0_88 = arith.constant 0 : index
      %391 = vector.load %arg8[%c0_87, %c0_88] : memref<1x16xf32, #tpu.memory_space<vmem>>, vector<1x16xf32>
      tpu.vector_store %arg8[%c0_87, %c0_88], %390 {strides = array<i32>} : memref<1x16xf32, #tpu.memory_space<vmem>>, vector<1x16xf32>,
    } else {
    }
    return
  }
  func.func @transform_0(%arg0: i32, %arg1: i32) -> (i32, i32, i32) {
    %c0_i32 = arith.constant 0 : i32
    %c0_i32_0 = arith.constant 0 : i32
    return %arg0, %arg1, %c0_i32 : i32, i32, i32
  }
  func.func @transform_1(%arg0: i32, %arg1: i32) -> (i32, i32) {
    %c0_i32 = arith.constant 0 : i32
    %c0_i32_0 = arith.constant 0 : i32
    %c0_i32_1 = arith.constant 0 : i32
    return %c0_i32, %c0_i32_0 : i32, i32
  }
  func.func @transform_2(%arg0: i32, %arg1: i32) -> (i32, i32) {
    %c0_i32 = arith.constant 0 : i32
    %c0_i32_0 = arith.constant 0 : i32
    %c0_i32_1 = arith.constant 0 : i32
    return %c0_i32, %c0_i32_0 : i32, i32
  }
  func.func @transform_3(%arg0: i32, %arg1: i32) -> (i32, i32) {
    %c0_i32 = arith.constant 0 : i32
    %c0_i32_0 = arith.constant 0 : i32
    %c0_i32_1 = arith.constant 0 : i32
    return %c0_i32, %c0_i32_0 : i32, i32
  }
  func.func @transform_4(%arg0: i32, %arg1: i32) -> (i32, i32) {
    %c0_i32 = arith.constant 0 : i32
    %c0_i32_0 = arith.constant 0 : i32
    %c0_i32_1 = arith.constant 0 : i32
    return %c0_i32, %c0_i32_0 : i32, i32
  }
  func.func @transform_5(%arg0: i32, %arg1: i32) -> (i32, i32) {
    %c0_i32 = arith.constant 0 : i32
    %c0_i32_0 = arith.constant 0 : i32
    %c0_i32_1 = arith.constant 0 : i32
    return %c0_i32, %c0_i32_0 : i32, i32
  }
  func.func @transform_6(%arg0: i32, %arg1: i32) -> (i32, i32) {
    %c0_i32 = arith.constant 0 : i32
    %c0_i32_0 = arith.constant 0 : i32
    return %c0_i32, %arg0 : i32, i32
  }
}

</mosaic_0001>

<bundles_post_ra>
// kernel: tpu_custom_call.1
= control target key start
LH: loop header
LB: loop body
LE: loop exit
PB: predicated region body
PF: predicated region fallthrough
CT: control target
= control target key end

     0   :  { %v2805_v1 = vmov 0.0   ;;  %vm171_vm0 = vcmask 1041408   ;;  %vm30_vm1 = vcmask 261120   ;;  %vm2806_vm2 = vmmov 0   ;;  %s2807_s9 = smov 32   ;;  %s3976_s0 = inlined_call_operand.vmem [shape: bf16[16,8,4], index: 0, kind: input, shape index: {}]   ;;  %s3977_s1 = inlined_call_operand.vmem [shape: bf16[4,128], index: 1, kind: input, shape index: {}]   ;;  %s3978_s2 = inlined_call_operand.vmem [shape: bf16[32,128], index: 2, kind: input, shape index: {}]   ;;  %s3979_s3 = inlined_call_operand.vmem [shape: f32[1,128], index: 3, kind: input, shape index: {}]   ;;  %s3980_s4 = inlined_call_operand.vmem [shape: f32[1,32], index: 4, kind: input, shape index: {}]   ;;  %s3981_s5 = inlined_call_operand.<no memory space> [shape: f32[1,1], index: 5, kind: input, shape index: {}]   ;;  %s3982_s6 = inlined_call_operand.hbm [shape: f32[1,16], index: 6, kind: output, shape index: {}]  }
   0x1   :  { %v2849_v0 = vld [vmem:[%s3978_s2 + $0x8] sm:$0xff]   ;;  %2402 = vmatprep.subr.bf16.mxu1 %v2805_v1  ;;  %2396 = vmatprep.subr.bf16.mxu0 %v2805_v1  ;;  %v2856_v2 = vld [vmem:[%s3978_s2] sm:$0xff]   ;;  %31 = vst.msk [vmem:[#allocation2] sm:$0xff] %vm30_vm1, %v2805_v1  ;;  %32 = vst.msk [vmem:[#allocation2 + $0x8] sm:$0xff] %vm30_vm1, %v2805_v1  ;;  %vm132_vm3 = vcmask 1041409   ;;  %vm135_vm4 = vcmask 1042434  }
   0x2   :  { %2403 = vmatpush3.bf16.msra.mxu1 %v2849_v0  ;;  %v35_v3 = vld [vmem:[%s3977_s1] sm:$0x3]  ;;  %2406 = vmatprep.mubr.msk.bf16.mxu1 %vm2806_vm2, %v2805_v1  ;;  %33 = vst.msk [vmem:[#allocation3] sm:$0xff] %vm30_vm1, %v2805_v1  ;;  %34 = vst.msk [vmem:[#allocation3 + $0x8] sm:$0xff] %vm30_vm1, %v2805_v1  ;;  %vm138_vm5 = vcmask 1043459   ;;  %vm141_vm6 = vcmask 1044484  }
   0x3   :  { %2404 = vmatprep.subr.bf16.mxu1 %v2805_v1  ;;  %v2863_v4 = vsel %vm171_vm0, %v35_v3, 0  ;;  %2398 = vmatprep.mubr.msk.bf16.mxu0 %vm2806_vm2, %v2805_v1  ;;  %v2884_v5 = vld [vmem:[%s3976_s0] ss:$0 sps:$4 sm:$0x11]   ;;  %vm144_vm7 = vcmask 1045509   ;;  %vm147_vm8 = vcmask 1046534  }
   0x4   :  { %2397 = vmatpush3.bf16.msra.mxu0 %v2863_v4  ;;  %v2889_v6 = vld [vmem:[%s3976_s0 + $0x4] ss:$0 sps:$4 sm:$0x11]   ;;  %v2894_v7 = vld [vmem:[%s3976_s0 + $0x8] ss:$0 sps:$4 sm:$0x11]   ;;  %v115_v25 = vunpack.c.l.b16 %v2884_v5 }
   0x5   :  { %2410 = vmatprep.subr.bf16.mxu0 %v2805_v1  ;;  %v2899_v9 = vld [vmem:[%s3976_s0 + $0xc] ss:$0 sps:$4 sm:$0x11]   ;;  %v2904_v11 = vld [vmem:[%s3976_s0 + $0x10] ss:$0 sps:$4 sm:$0x11]   ;;  %v116_v17 = vunpack.c.l.b16 %v2889_v6  ;;  %v117_v18 = vunpack.c.l.b16 %v2894_v7 }
   0x6   :  { %2405 = vmatpush3.bf16.msra.mxu1 %v2856_v2  ;;  %v2909_v12 = vld [vmem:[%s3976_s0 + $0x14] ss:$0 sps:$4 sm:$0x11]   ;;  %v2914_v13 = vld [vmem:[%s3976_s0 + $0x18] ss:$0 sps:$4 sm:$0x11]   ;;  %v118_v21 = vunpack.c.l.b16 %v2899_v9  ;;  %v119_v22 = vunpack.c.l.b16 %v2904_v11 }
   0x7   :  { %2418 = vmatprep.subr.bf16.mxu1 %v2805_v1  ;;  %v2919_v14 = vld [vmem:[%s3976_s0 + $0x1c] ss:$0 sps:$4 sm:$0x11]   ;;  %v2925_v15 = vld [vmem:[%s3976_s0 + $0x20] ss:$0 sps:$4 sm:$0x11]   ;;  %v120_v26 = vunpack.c.l.b16 %v2909_v12  ;;  %v121_v29 = vunpack.c.l.b16 %v2914_v13 }
   0x8   :  { %v41_v8 = vld [vmem:[#allocation2] sm:$0xff]  ;;  %v2937_v19 = vld [vmem:[%s3976_s0 + $0x28] ss:$0 sps:$4 sm:$0x11]   ;;  %v122_v30 = vunpack.c.l.b16 %v2919_v14  ;;  %v123_v31 = vunpack.c.l.b16 %v2925_v15  ;;  %v131_v35 = vrot.slane %v116_v17, 7  ;;  %v134_v36 = vrot.slane %v117_v18, 6 }
   0x9   :  { %v216_v10 = vpack.c.bf16 %v41_v8, %v41_v8  ;;  %v2930_v16 = vld [vmem:[%s3976_s0 + $0x24] ss:$0 sps:$4 sm:$0x11]   ;;  %v2942_v20 = vld [vmem:[%s3976_s0 + $0x2c] ss:$0 sps:$4 sm:$0x11]   ;;  %v125_v33 = vunpack.c.l.b16 %v2937_v19 }
   0xa   :  { %v2952_v23 = vld [vmem:[%s3976_s0 + $0x30] ss:$0 sps:$4 sm:$0x11]   ;;  %v2957_v24 = vld [vmem:[%s3976_s0 + $0x34] ss:$0 sps:$4 sm:$0x11]   ;;  %v124_v32 = vunpack.c.l.b16 %v2930_v16  ;;  %v126_v34 = vunpack.c.l.b16 %v2942_v20  ;;  %v133_v44 = vsel %vm132_vm3, %v131_v35, %v115_v25 }
   0xb   :  { %2407 = vmatmul.mubr.msk.bf16.vlgmr.msra.gmra.mxu1 %vm30_vm1, %v216_v10  ;;  %v2965_v27 = vld [vmem:[%s3976_s0 + $0x38] ss:$0 sps:$4 sm:$0x11]   ;;  %v2970_v28 = vld [vmem:[%s3976_s0 + $0x3c] ss:$0 sps:$4 sm:$0x11]   ;;  %v127_v38 = vunpack.c.l.b16 %v2952_v23  ;;  %v128_v39 = vunpack.c.l.b16 %v2957_v24  ;;  %v136_v47 = vsel %vm135_vm4, %v134_v36, %v133_v44 }
   0xc   :  { %2419 = vmatpush3.bf16.msra.mxu1 %v2863_v4  ;;  %2420 = vmatprep.mubr.msk.bf16.mxu1 %vm2806_vm2, %v2805_v1  ;;  %v42_v37 = vld [vmem:[#allocation3] sm:$0xff]  ;;  %v137_v40 = vrot.slane %v118_v21, 5  ;;  %v140_v41 = vrot.slane %v119_v22, 4  ;;  %v129_v42 = vunpack.c.l.b16 %v2965_v27  ;;  %v130_v43 = vunpack.c.l.b16 %v2970_v28  ;;  %v44_v46 = vld [vmem:[#allocation3 + $0x8] sm:$0xff] }
   0xd   :  { %2432 = vmatprep.subr.bf16.mxu1 %v2805_v1  ;;  %282 = vrot.lane.b32.xlu1 %v42_v37, %s2807_s9  ;;  %v143_v45 = vrot.slane %v120_v26, 3  ;;  %v146_v48 = vrot.slane %v121_v29, 2  ;;  %v152_v50 = vrot.slane %v124_v32, 7  ;;  %v154_v51 = vrot.slane %v125_v33, 6 }
   0xe   :  { %v139_v49 = vsel %vm138_vm5, %v137_v40, %v136_v47  ;;  %v156_v52 = vrot.slane %v126_v34, 5  ;;  %v158_v54 = vrot.slane %v127_v38, 4  ;;  %v149_v56 = vrot.slane %v122_v30, 1  ;;  %v43_v40 = vld [vmem:[#allocation2 + $0x8] sm:$0xff] }
   0xf   :  { %v142_v53 = vsel %vm141_vm6, %v140_v41, %v139_v49  ;;  %v153_v57 = vsel %vm132_vm3, %v152_v50, %v123_v31  ;;  %v160_v58 = vrot.slane %v128_v39, 3  ;;  %vm150_vm9 = vcmask 1047559  }
  0x10   :  { %v145_v55 = vsel %vm144_vm7, %v143_v45, %v142_v53  ;;  %v155_v60 = vsel %vm135_vm4, %v154_v51, %v153_v57  ;;  %v162_v61 = vrot.slane %v129_v42, 2  ;;  %v164_v63 = vrot.slane %v130_v43, 1 }
  0x11   :  { %355 = vrot.lane.b32.xlu1 %v44_v46, %s2807_s9  ;;  %v148_v59 = vsel %vm147_vm8, %v146_v48, %v145_v55  ;;  %v157_v62 = vsel %vm138_vm5, %v156_v52, %v155_v60  ;;  %vm167_vm10 = vcmask 31744   ;;  %v302_v41 = vpack.c.bf16 %v43_v40, %v43_v40 }
  0x12   :  { %v159_v3 = vsel %vm141_vm6, %v158_v54, %v157_v62  ;;  %v151_v8 = vsel %vm150_vm9, %v149_v56, %v148_v59 }
  0x13   :  { %v161_v10 = vsel %vm144_vm7, %v160_v58, %v159_v3 }
  0x14   :  { %v163_v35 = vsel %vm147_vm8, %v162_v61, %v161_v10 }
  0x15   :  { %v165_v36 = vsel %vm150_vm9, %v164_v63, %v163_v35 }
  0x16   :  { %v166_v37 = vpack.c.b16 %v165_v36, %v151_v8 }
  0x18   :  { %2399 = vmatmul.mubr.msk.bf16.vlgmr.msra.gmra.mxu0 %vm167_vm10, %v166_v37 }
  0x19   :  { %2411 = vmatpush3.bf16.msra.mxu0 %v2849_v0  ;;  %2414 = vmatprep.mubr.msk.bf16.mxu0 %vm2806_vm2, %v2805_v1 }
  0x1a   :  { %2412 = vmatprep.subr.bf16.mxu0 %v2805_v1 }
  0x1d   :  { %2413 = vmatpush3.bf16.msra.mxu0 %v2856_v2 }
  0x1e   :  { %2424 = vmatprep.subr.bf16.mxu0 %v2805_v1 }
  0x20   :  { %2415 = vmatmul.mubr.msk.bf16.vlgmr.msra.gmra.mxu0 %vm30_vm1, %v302_v41 }
  0x21   :  { %12 = vsyncpa [#allocation6], 0  ;;  %2425 = vmatpush3.bf16.msra.mxu0 %v2849_v0  ;;  %2428 = vmatprep.mubr.msk.bf16.mxu0 %vm2806_vm2, %v2805_v1  ;;  %v3047_v48 = vld [vmem:[%s3979_s3] ss:$0 sm:$0xff]  ;;  %v395_v5 = vrot.slane %v127_v38, 5  ;;  %v383_v15 = vrot.slane %v120_v26, 4 }
  0x22   :  { %2426 = vmatprep.subr.bf16.mxu0 %v2805_v1  ;;  %v397_v7 = vrot.slane %v128_v39, 4  ;;  %v385_v11 = vrot.slane %v121_v29, 3  ;;  %v399_v19 = vrot.slane %v129_v42, 3  ;;  %v387_v6 = vrot.slane %v122_v30, 2  ;;  %s2808_s12 = smov 64  }
  0x23   :  { %vm2203_vm11 = vcmask 130112   ;;  %vm2206_vm12 = vcmask 122880  }
  0x25   :  { %2427 = vmatpush3.bf16.msra.mxu0 %v2856_v2 }
  0x26   :  { %2440 = vmatprep.subr.bf16.mxu0 %v2805_v1 }
  0xcb   :  { %v267_v44 = vpop.f32.mrf.mxu1 }
  0xcd   :  { %v2408_v45 = vpop.f32.mrf.mxu1 }
  0xcf   :  { %v270_v46 = vpop.f32.mrf.mxu1 }
  0xd1   :  { %v2409_v47 = vpop.f32.mrf.mxu1 }
  0xd2   :  { %v283_v47 = vpop.permute.xlu1 %282 }
  0xd8   :  { %v209_v49 = vpop.f32.mrf.mxu0 }
  0xd9   :  { %v210_v50 = vadd.f32 %v3047_v48, %v209_v49 }
  0xda   :  { %v2400_v51 = vpop.f32.mrf.mxu0 }
  0xdb   :  { %v273_v52 = vadd.f32 %v267_v44, %v210_v50 }
  0xdc   :  { %v212_v53 = vpop.f32.mrf.mxu0 }
  0xdd   :  { %2644 = vtanh.f32 %v273_v52  ;;  %v213_v55 = vadd.f32 %v3047_v48, %v212_v53  ;;  %v2243_v63 = vmul.f32 -1.442695, %v273_v52  ;;  %v356_v52 = vpop.permute.xlu1 %355 }
  0xde   :  { %v2401_v54 = vpop.f32.mrf.mxu0 }
  0xe0   :  { %v340_v56 = vpop.f32.mrf.mxu0 }
  0xe1   :  { %v346_v57 = vadd.f32 %v340_v56, %v213_v55  ;;  %v375_v56 = vrot.slane %v115_v25, 1 }
  0xe2   :  { %v2416_v58 = vpop.f32.mrf.mxu0 }
  0xe3   :  { %2646 = vtanh.f32 %v346_v57  ;;  %v2245_v3 = vmul.f32 -1.442695, %v346_v57  ;;  %v389_v57 = vrot.slane %v123_v31, 1  ;;  %v377_v58 = vrot.slane %v117_v18, 7 }
  0xe4   :  { %v343_v59 = vpop.f32.mrf.mxu0  ;;  %2648 = vpow2.f32 %v2243_v63  ;;  %v376_v9 = vsel %vm132_vm3, %v116_v17, %v375_v56  ;;  %v401_v17 = vrot.slane %v130_v43, 2 }
  0xe5   :  { %2650 = vpow2.f32 %v2245_v3  ;;  %v391_v59 = vrot.slane %v125_v33, 7  ;;  %v390_v18 = vsel %vm132_vm3, %v124_v32, %v389_v57  ;;  %v378_v12 = vsel %vm135_vm4, %v377_v58, %v376_v9 }
  0xe6   :  { %v2417_v60 = vpop.f32.mrf.mxu0 }
  0xe7   :  { %v379_v60 = vrot.slane %v118_v21, 6  ;;  %v392_v20 = vsel %vm135_vm4, %v391_v59, %v390_v18 }
  0xe9   :  { %v380_v16 = vsel %vm138_vm5, %v379_v60, %v378_v12 }
  0xea   :  { %v2645_v61 = vpop.eup %2644 }
  0xeb   :  { %287 = vrot.lane.b32.xlu0 %v2645_v61, %s2807_s9  ;;  %v393_v61 = vrot.slane %v126_v34, 6 }
  0xf0   :  { %v2647_v62 = vpop.eup %2646 }
  0xf1   :  { %360 = vrot.lane.b32.xlu0 %v2647_v62, %s2807_s9  ;;  %v2649_v8 = vpop.eup %2648  ;;  %v381_v62 = vrot.slane %v119_v22, 5  ;;  %v394_v22 = vsel %vm138_vm5, %v393_v61, %v392_v20 }
  0xf2   :  { %v277_v10 = vadd.f32 1.0, %v2649_v8  ;;  %v2651_v35 = vpop.eup %2650  ;;  %v396_v23 = vsel %vm141_vm6, %v395_v5, %v394_v22 }
  0xf3   :  { %v350_v36 = vadd.f32 1.0, %v2651_v35  ;;  %v382_v13 = vsel %vm141_vm6, %v381_v62, %v380_v16  ;;  %v398_v25 = vsel %vm144_vm7, %v397_v7, %v396_v23  ;;  %v3165_v16 = vld [vmem:[%s3976_s0 + $0x8] ss:$0 sps:$4 sm:$0x22]  }
  0xf4   :  { %2652 = vrcp.f32 %v277_v10  ;;  %v384_v24 = vsel %vm144_vm7, %v383_v15, %v382_v13  ;;  %v400_v26 = vsel %vm147_vm8, %v399_v19, %v398_v25  ;;  %v3175_v13 = vld [vmem:[%s3976_s0 + $0x10] ss:$0 sps:$4 sm:$0x22]   ;;  %v3180_v23 = vld [vmem:[%s3976_s0 + $0x14] ss:$0 sps:$4 sm:$0x22]  }
  0xf5   :  { %2654 = vrcp.f32 %v350_v36  ;;  %v386_v14 = vsel %vm147_vm8, %v385_v11, %v384_v24  ;;  %v402_v28 = vsel %vm150_vm9, %v401_v17, %v400_v26  ;;  %v3155_v17 = vld [vmem:[%s3976_s0] ss:$0 sps:$4 sm:$0x22]   ;;  %v3186_v24 = vld [vmem:[%s3976_s0 + $0x18] ss:$0 sps:$4 sm:$0x22]  }
  0xf6   :  { %v388_v27 = vsel %vm150_vm9, %v387_v6, %v386_v14  ;;  %v3191_v25 = vld [vmem:[%s3976_s0 + $0x1c] ss:$0 sps:$4 sm:$0x22]   ;;  %v3196_v14 = vld [vmem:[%s3976_s0 + $0x20] ss:$0 sps:$4 sm:$0x22]  }
  0xf7   :  { %v403_v29 = vpack.c.b16 %v402_v28, %v388_v27  ;;  %v3201_v26 = vld [vmem:[%s3976_s0 + $0x24] ss:$0 sps:$4 sm:$0x22]   ;;  %v656_v27 = vunpack.c.l.b16 %v3155_v17 }
  0xf9   :  { %2421 = vmatmul.mubr.msk.bf16.vlgmr.msra.gmra.mxu1 %vm167_vm10, %v403_v29  ;;  %v3208_v29 = vld [vmem:[%s3976_s0 + $0x28] ss:$0 sps:$4 sm:$0x22]  }
  0xfa   :  { %2433 = vmatpush3.bf16.msra.mxu1 %v2849_v0  ;;  %2436 = vmatprep.mubr.msk.bf16.mxu1 %vm2806_vm2, %v2805_v1 }
  0xfb   :  { %2434 = vmatprep.subr.bf16.mxu1 %v2805_v1 }
  0xfe   :  { %2435 = vmatpush3.bf16.msra.mxu1 %v2856_v2 }
  0xff   :  { %2446 = vmatprep.subr.bf16.mxu1 %v2805_v1 }
 0x101   :  { %v2653_v37 = vpop.eup %2652 }
 0x102   :  { %v2655_v44 = vpop.eup %2654  ;;  %v285_v49 = vmul.f32 %v2653_v37, %v283_v47 }
 0x103   :  { %v358_v53 = vmul.f32 %v2655_v44, %v356_v52 }
 0x15d   :  { %v288_v40 = vpop.permute.xlu0 %287 }
 0x15e   :  { %v290_v41 = vmul.f32 %v2653_v37, %v288_v40 }
 0x160   :  { %292 = vrot.lane.b32.xlu0 %v290_v41, %s2807_s9 }
 0x163   :  { %v361_v45 = vpop.permute.xlu0 %360 }
 0x164   :  { %v363_v46 = vmul.f32 %v2655_v44, %v361_v45 }
 0x166   :  { %365 = vrot.lane.b32.xlu1 %v363_v46, %s2807_s9 }
 0x1b9   :  { %v441_v42 = vpop.f32.mrf.mxu1 }
 0x1ba   :  { %v442_v35 = vadd.f32 %v3047_v48, %v441_v42  ;;  %v662_v42 = vunpack.c.l.b16 %v3186_v24 }
 0x1bb   :  { %v2422_v43 = vpop.f32.mrf.mxu1 }
 0x1bc   :  { %v3233_v43 = vld [vmem:[%s3976_s0 + $0x38] ss:$0 sps:$4 sm:$0x22]  }
 0x1bd   :  { %v444_v63 = vpop.f32.mrf.mxu1 }
 0x1bf   :  { %v2423_v3 = vpop.f32.mrf.mxu1 }
 0x1c0   :  { %v663_v3 = vunpack.c.l.b16 %v3191_v25 }
 0x1d2   :  { %v293_v50 = vpop.permute.xlu0 %292 }
 0x1d3   :  { %v3055_v51 = vadd.f32 %v293_v50, %v285_v49 }
 0x1d5   :  { %2656 = vtanh.f32 %v3055_v51 }
 0x1d8   :  { %v366_v54 = vpop.permute.xlu1 %365 }
 0x1d9   :  { %v3058_v55 = vadd.f32 %v366_v54, %v358_v53 }
 0x1db   :  { %2658 = vtanh.f32 %v3058_v55 }
 0x1e2   :  { %v2657_v21 = vpop.eup %2656 }
 0x1e3   :  { %298 = vrot.lane.b32.xlu0 %v2657_v21, %s2807_s9 }
 0x1e8   :  { %v2659_v30 = vpop.eup %2658 }
 0x1e9   :  { %371 = vrot.lane.b32.xlu1 %v2659_v30, %s2807_s9  ;;  %v3213_v30 = vld [vmem:[%s3976_s0 + $0x2c] ss:$0 sps:$4 sm:$0x22]  }
 0x255   :  { %v299_v31 = vpop.permute.xlu0 %298 }
 0x256   :  { %v301_v32 = vmul.f32 %v2653_v37, %v299_v31 }
 0x258   :  { %v448_v33 = vpack.c.bf16 %v301_v32, %v301_v32  ;;  %v660_v32 = vunpack.c.l.b16 %v3175_v13  ;;  %v899_v13 = vrot.slane %v662_v42, 5 }
 0x25a   :  { %450 = vrot.lane.b32.xlu0 %v448_v33, %s2808_s12  ;;  %v3220_v33 = vld [vmem:[%s3976_s0 + $0x30] ss:$0 sps:$4 sm:$0x22]  }
 0x25b   :  { %v372_v34 = vpop.permute.xlu1 %371 }
 0x25c   :  { %v374_v38 = vmul.f32 %v2655_v44, %v372_v34  ;;  %v445_v44 = vadd.f32 %v3047_v48, %v444_v63  ;;  %v3225_v34 = vld [vmem:[%s3976_s0 + $0x34] ss:$0 sps:$4 sm:$0x22]   ;;  %v3238_v63 = vld [vmem:[%s3976_s0 + $0x3c] ss:$0 sps:$4 sm:$0x22]  }
 0x25e   :  { %v520_v39 = vpack.c.bf16 %v374_v38, %v374_v38  ;;  %v658_v38 = vunpack.c.l.b16 %v3165_v16 }
 0x260   :  { %522 = vrot.lane.b32.xlu1 %v520_v39, %s2808_s12  ;;  %v661_v39 = vunpack.c.l.b16 %v3180_v23 }
 0x2cc   :  { %v451_v8 = vpop.permute.xlu0 %450 }
 0x2cd   :  { %2429 = vmatmul.mubr.msk.bf16.vlgmr.msra.gmra.mxu0 %vm30_vm1, %v451_v8  ;;  %v664_v8 = vunpack.c.l.b16 %v3196_v14 }
 0x2ce   :  { %2441 = vmatpush3.bf16.msra.mxu0 %v2863_v4  ;;  %2442 = vmatprep.mubr.msk.bf16.mxu0 %vm2806_vm2, %v2805_v1 }
 0x2cf   :  { %2454 = vmatprep.subr.bf16.mxu0 %v2805_v1 }
 0x2d2   :  { %v523_v10 = vpop.permute.xlu1 %522 }
 0x2d3   :  { %2437 = vmatmul.mubr.msk.bf16.vlgmr.msra.gmra.mxu1 %vm30_vm1, %v523_v10  ;;  %v665_v10 = vunpack.c.l.b16 %v3201_v26  ;;  %v901_v26 = vrot.slane %v663_v3, 4 }
 0x2d4   :  { %2447 = vmatpush3.bf16.msra.mxu1 %v2849_v0  ;;  %2450 = vmatprep.mubr.msk.bf16.mxu1 %vm2806_vm2, %v2805_v1 }
 0x2d5   :  { %2448 = vmatprep.subr.bf16.mxu1 %v2805_v1  ;;  %v904_v17 = vrot.slane %v665_v10, 2 }
 0x2d8   :  { %2449 = vmatpush3.bf16.msra.mxu1 %v2856_v2 }
 0x2d9   :  { %2462 = vmatprep.subr.bf16.mxu1 %v2805_v1 }
 0x38d   :  { %v489_v36 = vpop.f32.mrf.mxu0 }
 0x38e   :  { %v495_v37 = vadd.f32 %v489_v36, %v442_v35  ;;  %v667_v35 = vunpack.c.l.b16 %v3213_v30 }
 0x38f   :  { %v2430_v40 = vpop.f32.mrf.mxu0 }
 0x390   :  { %2660 = vtanh.f32 %v495_v37  ;;  %v2248_v56 = vmul.f32 -1.442695, %v495_v37  ;;  %v666_v37 = vunpack.c.l.b16 %v3208_v29  ;;  %v668_v40 = vunpack.c.l.b16 %v3220_v33 }
 0x391   :  { %v492_v41 = vpop.f32.mrf.mxu0 }
 0x392   :  { %v672_v41 = vrot.slane %v656_v27, 2  ;;  %v909_v14 = vrot.slane %v668_v40, 7 }
 0x393   :  { %v2431_v45 = vpop.f32.mrf.mxu0  ;;  %v561_v46 = vpop.f32.mrf.mxu1 }
 0x394   :  { %v567_v47 = vadd.f32 %v561_v46, %v445_v44  ;;  %v669_v45 = vunpack.c.l.b16 %v3225_v34  ;;  %v670_v46 = vunpack.c.l.b16 %v3233_v43 }
 0x395   :  { %v2438_v49 = vpop.f32.mrf.mxu1 }
 0x396   :  { %2662 = vtanh.f32 %v567_v47  ;;  %v2250_v57 = vmul.f32 -1.442695, %v567_v47  ;;  %v678_v49 = vrot.slane %v660_v32, 6 }
 0x397   :  { %v564_v50 = vpop.f32.mrf.mxu1  ;;  %2664 = vpow2.f32 %v2248_v56 }
 0x398   :  { %2666 = vpow2.f32 %v2250_v57  ;;  %v671_v50 = vunpack.c.l.b16 %v3238_v63  ;;  %v686_v57 = vrot.slane %v664_v8, 2  ;;  %v3385_v63 = vld [vmem:[%s3978_s2 + $0x8] sm:$0xff]  }
 0x399   :  { %v2439_v52 = vpop.f32.mrf.mxu1 }
 0x39a   :  { %v915_v25 = vrot.slane %v671_v50, 4 }
 0x39d   :  { %v2661_v53 = vpop.eup %2660 }
 0x39e   :  { %505 = vrot.lane.b32.xlu0 %v2661_v53, %s2807_s9  ;;  %v680_v53 = vrot.slane %v661_v39, 5 }
 0x3a3   :  { %v2663_v54 = vpop.eup %2662 }
 0x3a4   :  { %577 = vrot.lane.b32.xlu1 %v2663_v54, %s2807_s9  ;;  %v2665_v58 = vpop.eup %2664  ;;  %v682_v54 = vrot.slane %v662_v42, 4 }
 0x3a5   :  { %v499_v59 = vadd.f32 1.0, %v2665_v58  ;;  %v2667_v60 = vpop.eup %2666  ;;  %v687_v58 = vrot.slane %v665_v10, 1 }
 0x3a6   :  { %v571_v61 = vadd.f32 1.0, %v2667_v60 }
 0x3a7   :  { %2668 = vrcp.f32 %v499_v59  ;;  %v690_v59 = vrot.slane %v667_v35, 7 }
 0x3a8   :  { %2670 = vrcp.f32 %v571_v61  ;;  %v692_v61 = vrot.slane %v668_v40, 6 }
 0x3b4   :  { %v3134_v62 = vpop.eup %2668 }
 0x3b5   :  { %v3138_v7 = vpop.eup %2670  ;;  %v503_v11 = vmul.f32 %v3134_v62, %v3055_v51  ;;  %v3160_v51 = vld [vmem:[%s3976_s0 + $0x4] ss:$0 sps:$4 sm:$0x22]  }
 0x3b6   :  { %v575_v20 = vmul.f32 %v3138_v7, %v3058_v55  ;;  %v3170_v55 = vld [vmem:[%s3976_s0 + $0xc] ss:$0 sps:$4 sm:$0x22]   ;;  %v657_v28 = vunpack.c.l.b16 %v3160_v51  ;;  %v906_v51 = vrot.slane %v666_v37, 1 }
 0x3b7   :  { %v659_v31 = vunpack.c.l.b16 %v3170_v55 }
 0x3b8   :  { %v673_v44 = vrot.slane %v657_v28, 1 }
 0x3b9   :  { %v676_v47 = vrot.slane %v659_v31, 7 }
 0x3ba   :  { %v674_v52 = vsel %vm132_vm3, %v673_v44, %v672_v41 }
 0x3bb   :  { %v675_v56 = vsel %vm135_vm4, %v658_v38, %v674_v52 }
 0x3bc   :  { %v677_v60 = vsel %vm138_vm5, %v676_v47, %v675_v56 }
 0x410   :  { %v506_v5 = vpop.permute.xlu0 %505 }
 0x411   :  { %v508_v15 = vmul.f32 %v3134_v62, %v506_v5  ;;  %v679_v5 = vsel %vm141_vm6, %v678_v49, %v677_v60 }
 0x413   :  { %510 = vrot.lane.b32.xlu0 %v508_v15, %s2807_s9  ;;  %v684_v15 = vrot.slane %v663_v3, 3 }
 0x416   :  { %v578_v9 = vpop.permute.xlu1 %577 }
 0x417   :  { %v580_v18 = vmul.f32 %v3138_v7, %v578_v9  ;;  %v688_v9 = vsel %vm132_vm3, %v687_v58, %v686_v57 }
 0x419   :  { %582 = vrot.lane.b32.xlu1 %v580_v18, %s2807_s9  ;;  %v694_v18 = vrot.slane %v669_v45, 5 }
 0x485   :  { %v511_v19 = vpop.permute.xlu0 %510 }
 0x486   :  { %v3144_v12 = vadd.f32 %v511_v19, %v503_v11  ;;  %v681_v11 = vsel %vm144_vm7, %v680_v53, %v679_v5  ;;  %v689_v19 = vsel %vm135_vm4, %v666_v37, %v688_v9 }
 0x488   :  { %2672 = vtanh.f32 %v3144_v12 }
 0x48b   :  { %v583_v21 = vpop.permute.xlu1 %582 }
 0x48c   :  { %v3149_v6 = vadd.f32 %v583_v21, %v575_v20  ;;  %v696_v20 = vrot.slane %v670_v46, 4  ;;  %v683_v21 = vsel %vm147_vm8, %v682_v54, %v681_v11 }
 0x48d   :  { %v685_v44 = vsel %vm150_vm9, %v684_v15, %v683_v21 }
 0x48e   :  { %2674 = vtanh.f32 %v3149_v6 }
 0x495   :  { %v2673_v22 = vpop.eup %2672 }
 0x496   :  { %516 = vrot.lane.b32.xlu0 %v2673_v22, %s2807_s9  ;;  %v691_v22 = vsel %vm138_vm5, %v690_v59, %v689_v19 }
 0x497   :  { %v693_v41 = vsel %vm141_vm6, %v692_v61, %v691_v22 }
 0x498   :  { %v695_v47 = vsel %vm144_vm7, %v694_v18, %v693_v41 }
 0x499   :  { %v697_v49 = vsel %vm147_vm8, %v696_v20, %v695_v47 }
 0x49b   :  { %v2675_v36 = vpop.eup %2674 }
 0x49c   :  { %588 = vrot.lane.b32.xlu1 %v2675_v36, %s2807_s9  ;;  %v698_v36 = vrot.slane %v671_v50, 3 }
 0x49e   :  { %v699_v52 = vsel %vm150_vm9, %v698_v36, %v697_v49 }
 0x49f   :  { %v700_v53 = vpack.c.b16 %v699_v52, %v685_v44 }
 0x4a1   :  { %2443 = vmatmul.mubr.msk.bf16.vlgmr.msra.gmra.mxu0 %vm167_vm10, %v700_v53 }
 0x4a2   :  { %2455 = vmatpush3.bf16.msra.mxu0 %v2849_v0  ;;  %2458 = vmatprep.mubr.msk.bf16.mxu0 %vm2806_vm2, %v2805_v1 }
 0x4a3   :  { %2456 = vmatprep.subr.bf16.mxu0 %v2805_v1 }
 0x4a6   :  { %2457 = vmatpush3.bf16.msra.mxu0 %v2856_v2 }
 0x4a7   :  { %2468 = vmatprep.subr.bf16.mxu0 %v2805_v1 }
 0x508   :  { %v517_v54 = vpop.permute.xlu0 %516 }
 0x509   :  { %v519_v56 = vmul.f32 %v3134_v62, %v517_v54 }
 0x50b   :  { %v745_v57 = vpack.c.bf16 %v519_v56, %v519_v56 }
 0x50d   :  { %747 = vrot.lane.b32.xlu0 %v745_v57, %s2808_s12 }
 0x50e   :  { %v589_v58 = vpop.permute.xlu1 %588 }
 0x50f   :  { %v591_v59 = vmul.f32 %v3138_v7, %v589_v58 }
 0x511   :  { %v817_v60 = vpack.c.bf16 %v591_v59, %v591_v59 }
 0x513   :  { %819 = vrot.lane.b32.xlu1 %v817_v60, %s2808_s12 }
 0x561   :  { %v738_v61 = vpop.f32.mrf.mxu0 }
 0x562   :  { %v739_v7 = vadd.f32 %v3047_v48, %v738_v61 }
 0x563   :  { %v2444_v5 = vpop.f32.mrf.mxu0 }
 0x565   :  { %v741_v15 = vpop.f32.mrf.mxu0 }
 0x566   :  { %v742_v22 = vadd.f32 %v3047_v48, %v741_v15 }
 0x567   :  { %v2445_v9 = vpop.f32.mrf.mxu0 }
 0x57f   :  { %v748_v18 = vpop.permute.xlu0 %747 }
 0x580   :  { %2451 = vmatmul.mubr.msk.bf16.vlgmr.msra.gmra.mxu1 %vm30_vm1, %v748_v18 }
 0x581   :  { %2463 = vmatpush3.bf16.msra.mxu1 %v2863_v4  ;;  %2464 = vmatprep.mubr.msk.bf16.mxu1 %vm2806_vm2, %v2805_v1 }
 0x582   :  { %2476 = vmatprep.subr.bf16.mxu1 %v2805_v1 }
 0x585   :  { %v820_v62 = vpop.permute.xlu1 %819 }
 0x586   :  { %2459 = vmatmul.mubr.msk.bf16.vlgmr.msra.gmra.mxu0 %vm30_vm1, %v820_v62 }
 0x587   :  { %2469 = vmatpush3.bf16.msra.mxu0 %v2849_v0  ;;  %2472 = vmatprep.mubr.msk.bf16.mxu0 %vm2806_vm2, %v2805_v1 }
 0x588   :  { %2470 = vmatprep.subr.bf16.mxu0 %v2805_v1 }
 0x58b   :  { %2471 = vmatpush3.bf16.msra.mxu0 %v2856_v2 }
 0x58c   :  { %2484 = vmatprep.subr.bf16.mxu0 %v2805_v1 }
 0x640   :  { %v786_v11 = vpop.f32.mrf.mxu1 }
 0x641   :  { %v792_v19 = vadd.f32 %v786_v11, %v739_v7 }
 0x642   :  { %v2452_v20 = vpop.f32.mrf.mxu1 }
 0x643   :  { %2676 = vtanh.f32 %v792_v19  ;;  %v2269_v53 = vmul.f32 -1.442695, %v792_v19 }
 0x644   :  { %v789_v21 = vpop.f32.mrf.mxu1 }
 0x646   :  { %v2453_v36 = vpop.f32.mrf.mxu1  ;;  %v858_v0 = vpop.f32.mrf.mxu0 }
 0x647   :  { %v864_v41 = vadd.f32 %v858_v0, %v742_v22  ;;  %v889_v22 = vrot.slane %v656_v27, 3  ;;  %v890_v36 = vrot.slane %v657_v28, 2  ;;  %v895_v0 = vrot.slane %v660_v32, 7 }
 0x648   :  { %v2460_v44 = vpop.f32.mrf.mxu0  ;;  %v911_v28 = vrot.slane %v669_v45, 6  ;;  %v913_v32 = vrot.slane %v670_v46, 5 }
 0x649   :  { %2678 = vtanh.f32 %v864_v41  ;;  %v2271_v54 = vmul.f32 -1.442695, %v864_v41  ;;  %v891_v44 = vsel %vm132_vm3, %v890_v36, %v889_v22 }
 0x64a   :  { %v861_v47 = vpop.f32.mrf.mxu0  ;;  %2680 = vpow2.f32 %v2269_v53 }
 0x64b   :  { %2682 = vpow2.f32 %v2271_v54  ;;  %v897_v47 = vrot.slane %v661_v39, 6 }
 0x64c   :  { %v2461_v49 = vpop.f32.mrf.mxu0 }
 0x650   :  { %v2677_v52 = vpop.eup %2676 }
 0x651   :  { %802 = vrot.lane.b32.xlu0 %v2677_v52, %s2807_s9 }
 0x656   :  { %v2679_v2 = vpop.eup %2678 }
 0x657   :  { %874 = vrot.lane.b32.xlu1 %v2679_v2, %s2807_s9  ;;  %v2681_v56 = vpop.eup %2680 }
 0x658   :  { %v796_v57 = vadd.f32 1.0, %v2681_v56  ;;  %v2683_v58 = vpop.eup %2682 }
 0x659   :  { %v868_v59 = vadd.f32 1.0, %v2683_v58 }
 0x65a   :  { %2684 = vrcp.f32 %v796_v57 }
 0x65b   :  { %2686 = vrcp.f32 %v868_v59 }
 0x667   :  { %v2685_v60 = vpop.eup %2684 }
 0x668   :  { %v2687_v15 = vpop.eup %2686  ;;  %v800_v62 = vmul.f32 %v2685_v60, %v3144_v12  ;;  %v892_v12 = vrot.slane %v658_v38, 1 }
 0x669   :  { %v872_v19 = vmul.f32 %v2687_v15, %v3149_v6  ;;  %v903_v6 = vrot.slane %v664_v8, 3  ;;  %v3394_v8 = vld [vmem:[%s3978_s2] sm:$0xff]  }
 0x66a   :  { %v893_v16 = vsel %vm135_vm4, %v892_v12, %v891_v44 }
 0x66b   :  { %v894_v23 = vsel %vm138_vm5, %v659_v31, %v893_v16  ;;  %v905_v27 = vsel %vm132_vm3, %v904_v17, %v903_v6 }
 0x66c   :  { %v896_v29 = vsel %vm141_vm6, %v895_v0, %v894_v23  ;;  %v907_v24 = vsel %vm135_vm4, %v906_v51, %v905_v27 }
 0x66d   :  { %v898_v33 = vsel %vm144_vm7, %v897_v47, %v896_v29  ;;  %v908_v55 = vsel %vm138_vm5, %v667_v35, %v907_v24  ;;  %v3437_v24 = vld [vmem:[%s3976_s0] ss:$0 sps:$4 sm:$0x44]  }
 0x66e   :  { %v900_v31 = vsel %vm147_vm8, %v899_v13, %v898_v33  ;;  %v910_v34 = vsel %vm141_vm6, %v909_v14, %v908_v55  ;;  %v3457_v55 = vld [vmem:[%s3976_s0 + $0x10] ss:$0 sps:$4 sm:$0x44]  }
 0x66f   :  { %v902_v39 = vsel %vm150_vm9, %v901_v26, %v900_v31  ;;  %v912_v42 = vsel %vm144_vm7, %v911_v28, %v910_v34  ;;  %v3468_v31 = vld [vmem:[%s3976_s0 + $0x18] ss:$0 sps:$4 sm:$0x44]   ;;  %v3473_v34 = vld [vmem:[%s3976_s0 + $0x1c] ss:$0 sps:$4 sm:$0x44]  }
 0x670   :  { %v914_v43 = vsel %vm147_vm8, %v913_v32, %v912_v42  ;;  %v3447_v32 = vld [vmem:[%s3976_s0 + $0x8] ss:$0 sps:$4 sm:$0x44]   ;;  %v1170_v42 = vunpack.c.l.b16 %v3437_v24 }
 0x671   :  { %v916_v30 = vsel %vm150_vm9, %v915_v25, %v914_v43  ;;  %v3462_v25 = vld [vmem:[%s3976_s0 + $0x14] ss:$0 sps:$4 sm:$0x44]  }
 0x672   :  { %v917_v3 = vpack.c.b16 %v916_v30, %v902_v39  ;;  %v3483_v39 = vld [vmem:[%s3976_s0 + $0x24] ss:$0 sps:$4 sm:$0x44]   ;;  %v3490_v30 = vld [vmem:[%s3976_s0 + $0x28] ss:$0 sps:$4 sm:$0x44]  }
 0x674   :  { %2465 = vmatmul.mubr.msk.bf16.vlgmr.msra.gmra.mxu1 %vm167_vm10, %v917_v3  ;;  %v3495_v3 = vld [vmem:[%s3976_s0 + $0x2c] ss:$0 sps:$4 sm:$0x44]  }
 0x675   :  { %2477 = vmatpush3.bf16.msra.mxu1 %v3385_v63  ;;  %2480 = vmatprep.mubr.msk.bf16.mxu1 %vm2806_vm2, %v2805_v1 }
 0x676   :  { %2478 = vmatprep.subr.bf16.mxu1 %v2805_v1 }
 0x679   :  { %2479 = vmatpush3.bf16.msra.mxu1 %v3394_v8 }
 0x67a   :  { %2490 = vmatprep.subr.bf16.mxu1 %v2805_v1 }
 0x6c3   :  { %v803_v61 = vpop.permute.xlu0 %802 }
 0x6c4   :  { %v805_v5 = vmul.f32 %v2685_v60, %v803_v61 }
 0x6c6   :  { %807 = vrot.lane.b32.xlu0 %v805_v5, %s2807_s9 }
 0x6c9   :  { %v875_v9 = vpop.permute.xlu1 %874 }
 0x6ca   :  { %v877_v18 = vmul.f32 %v2687_v15, %v875_v9 }
 0x6cc   :  { %879 = vrot.lane.b32.xlu1 %v877_v18, %s2807_s9 }
 0x734   :  { %v955_v50 = vpop.f32.mrf.mxu1 }
 0x735   :  { %v956_v56 = vadd.f32 %v3047_v48, %v955_v50  ;;  %v3514_v50 = vld [vmem:[%s3976_s0 + $0x3c] ss:$0 sps:$4 sm:$0x44]  }
 0x736   :  { %v2466_v49 = vpop.f32.mrf.mxu1 }
 0x737   :  { %v1174_v49 = vunpack.c.l.b16 %v3457_v55 }
 0x738   :  { %v808_v7 = vpop.permute.xlu0 %807  ;;  %v958_v52 = vpop.f32.mrf.mxu1 }
 0x739   :  { %v3326_v11 = vadd.f32 %v808_v7, %v800_v62  ;;  %v959_v61 = vadd.f32 %v3047_v48, %v958_v52 }
 0x73a   :  { %v2467_v2 = vpop.f32.mrf.mxu1 }
 0x73b   :  { %2688 = vtanh.f32 %v3326_v11  ;;  %v1179_v2 = vunpack.c.l.b16 %v3483_v39 }
 0x73d   :  { %v1418_v24 = vrot.slane %v1179_v2, 4 }
 0x73e   :  { %v880_v20 = vpop.permute.xlu1 %879 }
 0x73f   :  { %v3330_v21 = vadd.f32 %v880_v20, %v872_v19 }
 0x741   :  { %2690 = vtanh.f32 %v3330_v21 }
 0x748   :  { %v2689_v41 = vpop.eup %2688 }
 0x749   :  { %813 = vrot.lane.b32.xlu0 %v2689_v41, %s2807_s9 }
 0x74e   :  { %v2691_v38 = vpop.eup %2690 }
 0x74f   :  { %885 = vrot.lane.b32.xlu1 %v2691_v38, %s2807_s9  ;;  %v3478_v38 = vld [vmem:[%s3976_s0 + $0x20] ss:$0 sps:$4 sm:$0x44]  }
 0x750   :  { %v1178_v52 = vunpack.c.l.b16 %v3478_v38 }
 0x7bb   :  { %v814_v10 = vpop.permute.xlu0 %813 }
 0x7bc   :  { %v816_v35 = vmul.f32 %v2685_v60, %v814_v10  ;;  %v1172_v10 = vunpack.c.l.b16 %v3447_v32 }
 0x7be   :  { %v962_v37 = vpack.c.bf16 %v816_v35, %v816_v35 }
 0x7c0   :  { %964 = vrot.lane.b32.xlu0 %v962_v37, %s2808_s12  ;;  %v3502_v37 = vld [vmem:[%s3976_s0 + $0x34] ss:$0 sps:$4 sm:$0x44]  }
 0x7c1   :  { %v886_v40 = vpop.permute.xlu1 %885 }
 0x7c2   :  { %v888_v45 = vmul.f32 %v2687_v15, %v886_v40  ;;  %v1175_v40 = vunpack.c.l.b16 %v3462_v25 }
 0x7c4   :  { %v1034_v46 = vpack.c.bf16 %v888_v45, %v888_v45  ;;  %v1176_v45 = vunpack.c.l.b16 %v3468_v31 }
 0x7c6   :  { %1036 = vrot.lane.b32.xlu1 %v1034_v46, %s2808_s12  ;;  %v3509_v46 = vld [vmem:[%s3976_s0 + $0x38] ss:$0 sps:$4 sm:$0x44]   ;;  %v1413_v55 = vrot.slane %v1176_v45, 7 }
 0x832   :  { %v965_v53 = vpop.permute.xlu0 %964 }
 0x833   :  { %2473 = vmatmul.mubr.msk.bf16.vlgmr.msra.gmra.mxu0 %vm30_vm1, %v965_v53  ;;  %v1180_v53 = vunpack.c.l.b16 %v3490_v30 }
 0x834   :  { %2485 = vmatpush3.bf16.msra.mxu0 %v2863_v4  ;;  %2486 = vmatprep.mubr.msk.bf16.mxu0 %vm2806_vm2, %v2805_v1 }
 0x835   :  { %2498 = vmatprep.subr.bf16.mxu0 %v2805_v1 }
 0x838   :  { %v1037_v54 = vpop.permute.xlu1 %1036 }
 0x839   :  { %2481 = vmatmul.mubr.msk.bf16.vlgmr.msra.gmra.mxu1 %vm30_vm1, %v1037_v54 }
 0x83a   :  { %2491 = vmatpush3.bf16.msra.mxu1 %v3385_v63  ;;  %2494 = vmatprep.mubr.msk.bf16.mxu1 %vm2806_vm2, %v2805_v1 }
 0x83b   :  { %2492 = vmatprep.subr.bf16.mxu1 %v2805_v1 }
 0x83e   :  { %2493 = vmatpush3.bf16.msra.mxu1 %v3394_v8 }
 0x83f   :  { %2506 = vmatprep.subr.bf16.mxu1 %v2805_v1 }
 0x8f3   :  { %v1003_v57 = vpop.f32.mrf.mxu0 }
 0x8f4   :  { %v1009_v58 = vadd.f32 %v1003_v57, %v956_v56  ;;  %v3523_v56 = vld [vmem:[%s3976_s0 + $0x30] ss:$0 sps:$4 sm:$0x44]   ;;  %v1177_v57 = vunpack.c.l.b16 %v3473_v34 }
 0x8f5   :  { %v2474_v59 = vpop.f32.mrf.mxu0 }
 0x8f6   :  { %2692 = vtanh.f32 %v1009_v58  ;;  %v2274_v22 = vmul.f32 -1.442695, %v1009_v58  ;;  %v1181_v58 = vunpack.c.l.b16 %v3495_v3  ;;  %v1186_v59 = vrot.slane %v1170_v42, 4 }
 0x8f7   :  { %v1006_v60 = vpop.f32.mrf.mxu0  ;;  %v1415_v39 = vrot.slane %v1177_v57, 6 }
 0x8f8   :  { %v1422_v32 = vrot.slane %v1181_v58, 2 }
 0x8f9   :  { %v2475_v5 = vpop.f32.mrf.mxu0  ;;  %v1075_v15 = vpop.f32.mrf.mxu1 }
 0x8fa   :  { %v1081_v9 = vadd.f32 %v1075_v15, %v959_v61  ;;  %v1183_v61 = vunpack.c.l.b16 %v3502_v37  ;;  %v1184_v5 = vunpack.c.l.b16 %v3509_v46  ;;  %v1189_v15 = vrot.slane %v1172_v10, 2 }
 0x8fb   :  { %v2482_v18 = vpop.f32.mrf.mxu1 }
 0x8fc   :  { %2694 = vtanh.f32 %v1081_v9  ;;  %v2276_v36 = vmul.f32 -1.442695, %v1081_v9  ;;  %v1185_v18 = vunpack.c.l.b16 %v3514_v50 }
 0x8fd   :  { %v1078_v62 = vpop.f32.mrf.mxu1  ;;  %2696 = vpow2.f32 %v2274_v22  ;;  %v1200_v22 = vrot.slane %v1178_v52, 4 }
 0x8fe   :  { %2698 = vpow2.f32 %v2276_v36  ;;  %v1201_v36 = vrot.slane %v1179_v2, 3 }
 0x8ff   :  { %v2483_v7 = vpop.f32.mrf.mxu1 }
 0x900   :  { %v1194_v7 = vrot.slane %v1175_v40, 7 }
 0x903   :  { %v2693_v19 = vpop.eup %2692 }
 0x904   :  { %1019 = vrot.lane.b32.xlu0 %v2693_v19, %s2807_s9  ;;  %v1196_v19 = vrot.slane %v1176_v45, 6  ;;  %v1429_v45 = vrot.slane %v1185_v18, 6 }
 0x909   :  { %v2695_v20 = vpop.eup %2694 }
 0x90a   :  { %1091 = vrot.lane.b32.xlu1 %v2695_v20, %s2807_s9  ;;  %v2697_v12 = vpop.eup %2696 }
 0x90b   :  { %v1013_v0 = vadd.f32 1.0, %v2697_v12  ;;  %v2699_v6 = vpop.eup %2698  ;;  %v1203_v12 = vrot.slane %v1180_v53, 2 }
 0x90c   :  { %v1085_v41 = vadd.f32 1.0, %v2699_v6 }
 0x90d   :  { %2700 = vrcp.f32 %v1013_v0  ;;  %v1182_v0 = vunpack.c.l.b16 %v3523_v56 }
 0x90e   :  { %2702 = vrcp.f32 %v1085_v41  ;;  %v1205_v41 = vrot.slane %v1181_v58, 1 }
 0x90f   :  { %v1424_v38 = vrot.slane %v1182_v0, 1 }
 0x91a   :  { %v3416_v44 = vpop.eup %2700 }
 0x91b   :  { %v3420_v51 = vpop.eup %2702  ;;  %v1017_v14 = vmul.f32 %v3416_v44, %v3326_v11  ;;  %v3442_v11 = vld [vmem:[%s3976_s0 + $0x4] ss:$0 sps:$4 sm:$0x44]  }
 0x91c   :  { %v1089_v27 = vmul.f32 %v3420_v51, %v3330_v21  ;;  %v3452_v21 = vld [vmem:[%s3976_s0 + $0xc] ss:$0 sps:$4 sm:$0x44]   ;;  %v1171_v43 = vunpack.c.l.b16 %v3442_v11  ;;  %v1420_v11 = vrot.slane %v1180_v53, 3 }
 0x91d   :  { %v1173_v35 = vunpack.c.l.b16 %v3452_v21 }
 0x91e   :  { %v1187_v60 = vrot.slane %v1171_v43, 3 }
 0x91f   :  { %v1191_v9 = vrot.slane %v1173_v35, 1 }
 0x920   :  { %v1188_v62 = vsel %vm132_vm3, %v1187_v60, %v1186_v59 }
 0x921   :  { %v1190_v20 = vsel %vm135_vm4, %v1189_v15, %v1188_v62 }
 0x922   :  { %v1192_v6 = vsel %vm138_vm5, %v1191_v9, %v1190_v20 }
 0x976   :  { %v1020_v47 = vpop.permute.xlu0 %1019 }
 0x977   :  { %v1022_v17 = vmul.f32 %v3416_v44, %v1020_v47  ;;  %v1193_v47 = vsel %vm141_vm6, %v1174_v49, %v1192_v6 }
 0x979   :  { %1024 = vrot.lane.b32.xlu0 %v1022_v17, %s2807_s9  ;;  %v1198_v17 = vrot.slane %v1177_v57, 5 }
 0x97c   :  { %v1092_v16 = vpop.permute.xlu1 %1091 }
 0x97d   :  { %v1094_v13 = vmul.f32 %v3420_v51, %v1092_v16  ;;  %v1202_v16 = vsel %vm132_vm3, %v1201_v36, %v1200_v22 }
 0x97f   :  { %1096 = vrot.lane.b32.xlu1 %v1094_v13, %s2807_s9  ;;  %v1208_v13 = vrot.slane %v1183_v61, 7 }
 0x9eb   :  { %v1025_v23 = vpop.permute.xlu0 %1024 }
 0x9ec   :  { %v3426_v26 = vadd.f32 %v1025_v23, %v1017_v14  ;;  %v1195_v14 = vsel %vm144_vm7, %v1194_v7, %v1193_v47  ;;  %v1204_v23 = vsel %vm135_vm4, %v1203_v12, %v1202_v16 }
 0x9ee   :  { %2704 = vtanh.f32 %v3426_v26 }
 0x9f1   :  { %v1097_v28 = vpop.permute.xlu1 %1096 }
 0x9f2   :  { %v3431_v29 = vadd.f32 %v1097_v28, %v1089_v27  ;;  %v1210_v27 = vrot.slane %v1184_v5, 6  ;;  %v1197_v28 = vsel %vm147_vm8, %v1196_v19, %v1195_v14 }
 0x9f3   :  { %v1199_v60 = vsel %vm150_vm9, %v1198_v17, %v1197_v28 }
 0x9f4   :  { %2706 = vtanh.f32 %v3431_v29 }
 0x9fb   :  { %v2705_v33 = vpop.eup %2704 }
 0x9fc   :  { %1030 = vrot.lane.b32.xlu0 %v2705_v33, %s2807_s9  ;;  %v1206_v33 = vsel %vm138_vm5, %v1205_v41, %v1204_v23 }
 0x9fd   :  { %v1207_v59 = vsel %vm141_vm6, %v1182_v0, %v1206_v33 }
 0x9fe   :  { %v1209_v15 = vsel %vm144_vm7, %v1208_v13, %v1207_v59 }
 0x9ff   :  { %v1211_v9 = vsel %vm147_vm8, %v1210_v27, %v1209_v15 }
 0xa01   :  { %v2707_v54 = vpop.eup %2706 }
 0xa02   :  { %1102 = vrot.lane.b32.xlu1 %v2707_v54, %s2807_s9  ;;  %v1212_v54 = vrot.slane %v1185_v18, 5 }
 0xa04   :  { %v1213_v62 = vsel %vm150_vm9, %v1212_v54, %v1211_v9 }
 0xa05   :  { %v1214_v7 = vpack.c.b16 %v1213_v62, %v1199_v60 }
 0xa07   :  { %2487 = vmatmul.mubr.msk.bf16.vlgmr.msra.gmra.mxu0 %vm167_vm10, %v1214_v7 }
 0xa08   :  { %2499 = vmatpush3.bf16.msra.mxu0 %v3385_v63  ;;  %2502 = vmatprep.mubr.msk.bf16.mxu0 %vm2806_vm2, %v2805_v1 }
 0xa09   :  { %2500 = vmatprep.subr.bf16.mxu0 %v2805_v1 }
 0xa0c   :  { %2501 = vmatpush3.bf16.msra.mxu0 %v3394_v8 }
 0xa0d   :  { %2512 = vmatprep.subr.bf16.mxu0 %v2805_v1 }
 0xa6e   :  { %v1031_v19 = vpop.permute.xlu0 %1030 }
 0xa6f   :  { %v1033_v20 = vmul.f32 %v3416_v44, %v1031_v19 }
 0xa71   :  { %v1259_v22 = vpack.c.bf16 %v1033_v20, %v1033_v20 }
 0xa73   :  { %1261 = vrot.lane.b32.xlu0 %v1259_v22, %s2808_s12 }
 0xa74   :  { %v1103_v36 = vpop.permute.xlu1 %1102 }
 0xa75   :  { %v1105_v12 = vmul.f32 %v3420_v51, %v1103_v36 }
 0xa77   :  { %v1331_v6 = vpack.c.bf16 %v1105_v12, %v1105_v12 }
 0xa79   :  { %1333 = vrot.lane.b32.xlu1 %v1331_v6, %s2808_s12 }
 0xac7   :  { %v1252_v41 = vpop.f32.mrf.mxu0 }
 0xac8   :  { %v1253_v51 = vadd.f32 %v3047_v48, %v1252_v41 }
 0xac9   :  { %v2488_v47 = vpop.f32.mrf.mxu0 }
 0xacb   :  { %v1255_v17 = vpop.f32.mrf.mxu0 }
 0xacc   :  { %v1256_v33 = vadd.f32 %v3047_v48, %v1255_v17 }
 0xacd   :  { %v2489_v16 = vpop.f32.mrf.mxu0 }
 0xae5   :  { %v1262_v13 = vpop.permute.xlu0 %1261 }
 0xae6   :  { %2495 = vmatmul.mubr.msk.bf16.vlgmr.msra.gmra.mxu1 %vm30_vm1, %v1262_v13 }
 0xae7   :  { %2507 = vmatpush3.bf16.msra.mxu1 %v2863_v4  ;;  %2508 = vmatprep.mubr.msk.bf16.mxu1 %vm2806_vm2, %v2805_v1 }
 0xae8   :  { %2520 = vmatprep.subr.bf16.mxu1 %v2805_v1 }
 0xaeb   :  { %v1334_v44 = vpop.permute.xlu1 %1333 }
 0xaec   :  { %2503 = vmatmul.mubr.msk.bf16.vlgmr.msra.gmra.mxu0 %vm30_vm1, %v1334_v44 }
 0xaed   :  { %2513 = vmatpush3.bf16.msra.mxu0 %v3385_v63  ;;  %2516 = vmatprep.mubr.msk.bf16.mxu0 %vm2806_vm2, %v2805_v1 }
 0xaee   :  { %2514 = vmatprep.subr.bf16.mxu0 %v2805_v1 }
 0xaf1   :  { %2515 = vmatpush3.bf16.msra.mxu0 %v3394_v8 }
 0xaf2   :  { %2528 = vmatprep.subr.bf16.mxu0 %v2805_v1 }
 0xba6   :  { %v1300_v14 = vpop.f32.mrf.mxu1 }
 0xba7   :  { %v1306_v23 = vadd.f32 %v1300_v14, %v1253_v51 }
 0xba8   :  { %v2496_v27 = vpop.f32.mrf.mxu1 }
 0xba9   :  { %2708 = vtanh.f32 %v1306_v23  ;;  %v2295_v20 = vmul.f32 -1.442695, %v1306_v23 }
 0xbaa   :  { %v1303_v28 = vpop.f32.mrf.mxu1 }
 0xbac   :  { %v2497_v54 = vpop.f32.mrf.mxu1  ;;  %v1372_v59 = vpop.f32.mrf.mxu0 }
 0xbad   :  { %v1378_v60 = vadd.f32 %v1372_v59, %v1256_v33  ;;  %v1403_v54 = vrot.slane %v1170_v42, 5  ;;  %v1404_v59 = vrot.slane %v1171_v43, 4 }
 0xbae   :  { %v2504_v15 = vpop.f32.mrf.mxu0 }
 0xbaf   :  { %2710 = vtanh.f32 %v1378_v60  ;;  %v2297_v22 = vmul.f32 -1.442695, %v1378_v60  ;;  %v1408_v60 = vrot.slane %v1173_v35, 2  ;;  %v1417_v15 = vrot.slane %v1178_v52, 5 }
 0xbb0   :  { %v1375_v9 = vpop.f32.mrf.mxu0  ;;  %2712 = vpow2.f32 %v2295_v20 }
 0xbb1   :  { %2714 = vpow2.f32 %v2297_v22  ;;  %v1419_v43 = vsel %vm132_vm3, %v1418_v24, %v1417_v15  ;;  %v3687_v22 = vld [vmem:[%s3979_s3] ss:$0 sm:$0xff] }
 0xbb2   :  { %v2505_v62 = vpop.f32.mrf.mxu0  ;;  %v1421_v3 = vsel %vm135_vm4, %v1420_v11, %v1419_v43 }
 0xbb3   :  { %v1405_v62 = vsel %vm132_vm3, %v1404_v59, %v1403_v54  ;;  %v1423_v35 = vsel %vm138_vm5, %v1422_v32, %v1421_v3  ;;  %v3714_v3 = vld [vmem:[%s3976_s0] ss:$0 sps:$4 sm:$0x88]  }
 0xbb6   :  { %v2709_v7 = vpop.eup %2708 }
 0xbb7   :  { %1316 = vrot.lane.b32.xlu0 %v2709_v7, %s2807_s9 }
 0xbbc   :  { %v2711_v19 = vpop.eup %2710 }
 0xbbd   :  { %1388 = vrot.lane.b32.xlu1 %v2711_v19, %s2807_s9  ;;  %v2713_v36 = vpop.eup %2712 }
 0xbbe   :  { %v1310_v12 = vadd.f32 1.0, %v2713_v36  ;;  %v2715_v48 = vpop.eup %2714 }
 0xbbf   :  { %v1382_v6 = vadd.f32 1.0, %v2715_v48 }
 0xbc0   :  { %2716 = vrcp.f32 %v1310_v12 }
 0xbc1   :  { %2718 = vrcp.f32 %v1382_v6 }
 0xbcd   :  { %v2717_v41 = vpop.eup %2716 }
 0xbce   :  { %v2719_v16 = vpop.eup %2718  ;;  %v1314_v51 = vmul.f32 %v2717_v41, %v3426_v26  ;;  %v1406_v26 = vrot.slane %v1172_v10, 3  ;;  %v1427_v10 = vrot.slane %v1184_v5, 7 }
 0xbcf   :  { %v1386_v27 = vmul.f32 %v2719_v16, %v3431_v29  ;;  %v1410_v29 = vrot.slane %v1174_v49, 1  ;;  %v1425_v49 = vsel %vm141_vm6, %v1424_v38, %v1423_v35  ;;  %v3734_v35 = vld [vmem:[%s3976_s0 + $0x10] ss:$0 sps:$4 sm:$0x88]  }
 0xbd0   :  { %v1407_v21 = vsel %vm135_vm4, %v1406_v26, %v1405_v62  ;;  %v1426_v46 = vsel %vm144_vm7, %v1183_v61, %v1425_v49  ;;  %v3750_v49 = vld [vmem:[%s3976_s0 + $0x1c] ss:$0 sps:$4 sm:$0x88]  }
 0xbd1   :  { %v1409_v42 = vsel %vm138_vm5, %v1408_v60, %v1407_v21  ;;  %v1428_v25 = vsel %vm147_vm8, %v1427_v10, %v1426_v46  ;;  %v3724_v10 = vld [vmem:[%s3976_s0 + $0x8] ss:$0 sps:$4 sm:$0x88]   ;;  %v1684_v46 = vunpack.c.l.b16 %v3714_v3 }
 0xbd2   :  { %v1411_v30 = vsel %vm141_vm6, %v1410_v29, %v1409_v42 }
 0xbd3   :  { %v1412_v31 = vsel %vm144_vm7, %v1175_v40, %v1411_v30  ;;  %v1430_v40 = vsel %vm150_vm9, %v1429_v45, %v1428_v25  ;;  %v3739_v45 = vld [vmem:[%s3976_s0 + $0x14] ss:$0 sps:$4 sm:$0x88]  }
 0xbd4   :  { %v1414_v34 = vsel %vm147_vm8, %v1413_v55, %v1412_v31 }
 0xbd5   :  { %v1416_v2 = vsel %vm150_vm9, %v1415_v39, %v1414_v34  ;;  %v3745_v34 = vld [vmem:[%s3976_s0 + $0x18] ss:$0 sps:$4 sm:$0x88]  }
 0xbd6   :  { %v1431_v53 = vpack.c.b16 %v1430_v40, %v1416_v2  ;;  %v3760_v2 = vld [vmem:[%s3976_s0 + $0x24] ss:$0 sps:$4 sm:$0x88]   ;;  %v3767_v40 = vld [vmem:[%s3976_s0 + $0x28] ss:$0 sps:$4 sm:$0x88]  }
 0xbd8   :  { %2509 = vmatmul.mubr.msk.bf16.vlgmr.msra.gmra.mxu1 %vm167_vm10, %v1431_v53  ;;  %v3772_v53 = vld [vmem:[%s3976_s0 + $0x2c] ss:$0 sps:$4 sm:$0x88]  }
 0xbd9   :  { %2521 = vmatpush3.bf16.msra.mxu1 %v3385_v63  ;;  %2524 = vmatprep.mubr.msk.bf16.mxu1 %vm2806_vm2, %v2805_v1 }
 0xbda   :  { %2522 = vmatprep.subr.bf16.mxu1 %v2805_v1 }
 0xbdd   :  { %2523 = vmatpush3.bf16.msra.mxu1 %v3394_v8 }
 0xbde   :  { %2534 = vmatprep.subr.bf16.mxu1 %v2805_v1 }
 0xc29   :  { %v1317_v47 = vpop.permute.xlu0 %1316 }
 0xc2a   :  { %v1319_v17 = vmul.f32 %v2717_v41, %v1317_v47 }
 0xc2c   :  { %1321 = vrot.lane.b32.xlu0 %v1319_v17, %s2807_s9 }
 0xc2f   :  { %v1389_v13 = vpop.permute.xlu1 %1388 }
 0xc30   :  { %v1391_v44 = vmul.f32 %v2719_v16, %v1389_v13 }
 0xc32   :  { %1393 = vrot.lane.b32.xlu1 %v1391_v44, %s2807_s9 }
 0xc98   :  { %v1469_v5 = vpop.f32.mrf.mxu1 }
 0xc99   :  { %v1470_v36 = vadd.f32 %v3687_v22, %v1469_v5  ;;  %v3791_v5 = vld [vmem:[%s3976_s0 + $0x3c] ss:$0 sps:$4 sm:$0x88]  }
 0xc9a   :  { %v2510_v18 = vpop.f32.mrf.mxu1 }
 0xc9b   :  { %v1690_v18 = vunpack.c.l.b16 %v3745_v34 }
 0xc9c   :  { %v1472_v0 = vpop.f32.mrf.mxu1 }
 0xc9d   :  { %v1473_v47 = vadd.f32 %v3687_v22, %v1472_v0 }
 0xc9e   :  { %v1322_v14 = vpop.permute.xlu0 %1321  ;;  %v2511_v7 = vpop.f32.mrf.mxu1 }
 0xc9f   :  { %v3608_v23 = vadd.f32 %v1322_v14, %v1314_v51  ;;  %v1693_v7 = vunpack.c.l.b16 %v3760_v2 }
 0xca1   :  { %2720 = vtanh.f32 %v3608_v23 }
 0xca4   :  { %v1394_v28 = vpop.permute.xlu1 %1393 }
 0xca5   :  { %v3612_v33 = vadd.f32 %v1394_v28, %v1386_v27 }
 0xca7   :  { %2722 = vtanh.f32 %v3612_v33 }
 0xcae   :  { %v2721_v9 = vpop.eup %2720 }
 0xcaf   :  { %1327 = vrot.lane.b32.xlu0 %v2721_v9, %s2807_s9 }
 0xcb4   :  { %v2723_v52 = vpop.eup %2722 }
 0xcb5   :  { %1399 = vrot.lane.b32.xlu1 %v2723_v52, %s2807_s9  ;;  %v3755_v52 = vld [vmem:[%s3976_s0 + $0x20] ss:$0 sps:$4 sm:$0x88]  }
 0xcb6   :  { %v1692_v0 = vunpack.c.l.b16 %v3755_v52 }
 0xd21   :  { %v1328_v37 = vpop.permute.xlu0 %1327 }
 0xd22   :  { %v1330_v50 = vmul.f32 %v2717_v41, %v1328_v37  ;;  %v1686_v37 = vunpack.c.l.b16 %v3724_v10 }
 0xd24   :  { %v1476_v56 = vpack.c.bf16 %v1330_v50, %v1330_v50 }
 0xd26   :  { %1478 = vrot.lane.b32.xlu0 %v1476_v56, %s2808_s12  ;;  %v3779_v56 = vld [vmem:[%s3976_s0 + $0x30] ss:$0 sps:$4 sm:$0x88]  }
 0xd27   :  { %v1400_v57 = vpop.permute.xlu1 %1399 }
 0xd28   :  { %v1402_v58 = vmul.f32 %v2719_v16, %v1400_v57  ;;  %v3784_v57 = vld [vmem:[%s3976_s0 + $0x34] ss:$0 sps:$4 sm:$0x88]  }
 0xd2a   :  { %v1548_v61 = vpack.c.bf16 %v1402_v58, %v1402_v58  ;;  %v1688_v58 = vunpack.c.l.b16 %v3734_v35 }
 0xd2c   :  { %1550 = vrot.lane.b32.xlu1 %v1548_v61, %s2808_s12  ;;  %v1689_v61 = vunpack.c.l.b16 %v3739_v45  ;;  %v1928_v45 = vrot.slane %v1690_v18, 1 }
 0xd98   :  { %v1479_v19 = vpop.permute.xlu0 %1478 }
 0xd99   :  { %2517 = vmatmul.mubr.msk.bf16.vlgmr.msra.gmra.mxu0 %vm30_vm1, %v1479_v19  ;;  %v1694_v19 = vunpack.c.l.b16 %v3767_v40 }
 0xd9a   :  { %2529 = vmatpush3.bf16.msra.mxu0 %v2863_v4  ;;  %2530 = vmatprep.mubr.msk.bf16.mxu0 %vm2806_vm2, %v2805_v1 }
 0xd9b   :  { %2542 = vmatprep.subr.bf16.mxu0 %v2805_v1  ;;  %v1934_v10 = vrot.slane %v1694_v19, 5 }
 0xd9e   :  { %v1551_v20 = vpop.permute.xlu1 %1550 }
 0xd9f   :  { %2525 = vmatmul.mubr.msk.bf16.vlgmr.msra.gmra.mxu1 %vm30_vm1, %v1551_v20 }
 0xda0   :  { %2535 = vmatpush3.bf16.msra.mxu1 %v3385_v63  ;;  %2538 = vmatprep.mubr.msk.bf16.mxu1 %vm2806_vm2, %v2805_v1 }
 0xda1   :  { %2536 = vmatprep.subr.bf16.mxu1 %v2805_v1 }
 0xda4   :  { %2537 = vmatpush3.bf16.msra.mxu1 %v3394_v8 }
 0xda5   :  { %2550 = vmatprep.subr.bf16.mxu1 %v2805_v1 }
 0xe59   :  { %v1517_v12 = vpop.f32.mrf.mxu0 }
 0xe5a   :  { %v1523_v48 = vadd.f32 %v1517_v12, %v1470_v36  ;;  %v1695_v36 = vunpack.c.l.b16 %v3772_v53  ;;  %v1696_v12 = vunpack.c.l.b16 %v3779_v56 }
 0xe5b   :  { %v2518_v6 = vpop.f32.mrf.mxu0 }
 0xe5c   :  { %2724 = vtanh.f32 %v1523_v48  ;;  %v2300_v54 = vmul.f32 -1.442695, %v1523_v48  ;;  %v1700_v48 = vrot.slane %v1684_v46, 6  ;;  %v1938_v52 = vrot.slane %v1696_v12, 3 }
 0xe5d   :  { %v1520_v41 = vpop.f32.mrf.mxu0 }
 0xe5e   :  { %v1691_v41 = vunpack.c.l.b16 %v3750_v49 }
 0xe5f   :  { %v2519_v17 = vpop.f32.mrf.mxu0  ;;  %v1589_v16 = vpop.f32.mrf.mxu1 }
 0xe60   :  { %v1595_v13 = vadd.f32 %v1589_v16, %v1473_v47  ;;  %v1697_v47 = vunpack.c.l.b16 %v3784_v57  ;;  %v1703_v17 = vrot.slane %v1686_v37, 4 }
 0xe61   :  { %v2526_v44 = vpop.f32.mrf.mxu1 }
 0xe62   :  { %2726 = vtanh.f32 %v1595_v13  ;;  %v2302_v59 = vmul.f32 -1.442695, %v1595_v13  ;;  %v3813_v13 = vld [vmem:[%s3976_s0 + $0x38] ss:$0 sps:$4 sm:$0x88]   ;;  %v1699_v44 = vunpack.c.l.b16 %v3791_v5  ;;  %v1940_v40 = vrot.slane %v1697_v47, 2 }
 0xe63   :  { %v1592_v51 = vpop.f32.mrf.mxu1  ;;  %2728 = vpow2.f32 %v2300_v54  ;;  %v1714_v54 = vrot.slane %v1692_v0, 6 }
 0xe64   :  { %2730 = vpow2.f32 %v2302_v59  ;;  %v1715_v59 = vrot.slane %v1693_v7, 5 }
 0xe65   :  { %v2527_v14 = vpop.f32.mrf.mxu1 }
 0xe66   :  { %v1707_v14 = vrot.slane %v1688_v58, 2 }
 0xe69   :  { %v2725_v27 = vpop.eup %2724 }
 0xe6a   :  { %1533 = vrot.lane.b32.xlu0 %v2725_v27, %s2807_s9  ;;  %v1709_v27 = vrot.slane %v1689_v61, 1 }
 0xe6f   :  { %v2727_v28 = vpop.eup %2726 }
 0xe70   :  { %1605 = vrot.lane.b32.xlu1 %v2727_v28, %s2807_s9  ;;  %v2729_v26 = vpop.eup %2728 }
 0xe71   :  { %v1527_v60 = vadd.f32 1.0, %v2729_v26  ;;  %v2731_v29 = vpop.eup %2730  ;;  %v1717_v26 = vrot.slane %v1694_v19, 4 }
 0xe72   :  { %v1599_v15 = vadd.f32 1.0, %v2731_v29  ;;  %v1719_v29 = vrot.slane %v1695_v36, 3 }
 0xe73   :  { %2732 = vrcp.f32 %v1527_v60 }
 0xe74   :  { %2734 = vrcp.f32 %v1599_v15  ;;  %v1721_v15 = vrot.slane %v1696_v12, 2 }
 0xe80   :  { %v3693_v9 = vpop.eup %2732 }
 0xe81   :  { %v3697_v11 = vpop.eup %2734  ;;  %v1531_v55 = vmul.f32 %v3693_v9, %v3608_v23  ;;  %v3719_v23 = vld [vmem:[%s3976_s0 + $0x4] ss:$0 sps:$4 sm:$0x88]  }
 0xe82   :  { %v1603_v39 = vmul.f32 %v3697_v11, %v3612_v33  ;;  %v3729_v33 = vld [vmem:[%s3976_s0 + $0xc] ss:$0 sps:$4 sm:$0x88]   ;;  %v1685_v25 = vunpack.c.l.b16 %v3719_v23  ;;  %v1932_v23 = vrot.slane %v1693_v7, 6 }
 0xe83   :  { %v1687_v50 = vunpack.c.l.b16 %v3729_v33  ;;  %v1936_v33 = vrot.slane %v1695_v36, 4 }
 0xe84   :  { %v1701_v6 = vrot.slane %v1685_v25, 5 }
 0xe85   :  { %v1705_v16 = vrot.slane %v1687_v50, 3 }
 0xe86   :  { %v1702_v51 = vsel %vm132_vm3, %v1701_v6, %v1700_v48 }
 0xe87   :  { %v1704_v28 = vsel %vm135_vm4, %v1703_v17, %v1702_v51 }
 0xe88   :  { %v1706_v60 = vsel %vm138_vm5, %v1705_v16, %v1704_v28 }
 0xedc   :  { %v1534_v62 = vpop.permute.xlu0 %1533 }
 0xedd   :  { %v1536_v24 = vmul.f32 %v3693_v9, %v1534_v62  ;;  %v1708_v62 = vsel %vm141_vm6, %v1707_v14, %v1706_v60 }
 0xedf   :  { %1538 = vrot.lane.b32.xlu0 %v1536_v24, %s2807_s9  ;;  %v1712_v24 = vrot.slane %v1691_v41, 7 }
 0xee2   :  { %v1606_v32 = vpop.permute.xlu1 %1605 }
 0xee3   :  { %v1608_v21 = vmul.f32 %v3697_v11, %v1606_v32  ;;  %v1716_v32 = vsel %vm132_vm3, %v1715_v59, %v1714_v54 }
 0xee5   :  { %1610 = vrot.lane.b32.xlu1 %v1608_v21, %s2807_s9  ;;  %v1723_v21 = vrot.slane %v1697_v47, 1 }
 0xf51   :  { %v1539_v38 = vpop.permute.xlu0 %1538 }
 0xf52   :  { %v3703_v42 = vadd.f32 %v1539_v38, %v1531_v55  ;;  %v1698_v55 = vunpack.c.l.b16 %v3813_v13  ;;  %v1710_v38 = vsel %vm144_vm7, %v1709_v27, %v1708_v62 }
 0xf54   :  { %2736 = vtanh.f32 %v3703_v42 }
 0xf57   :  { %v1611_v43 = vpop.permute.xlu1 %1610 }
 0xf58   :  { %v3708_v30 = vadd.f32 %v1611_v43, %v1603_v39  ;;  %v1718_v39 = vsel %vm135_vm4, %v1717_v26, %v1716_v32  ;;  %v1711_v43 = vsel %vm147_vm8, %v1690_v18, %v1710_v38 }
 0xf59   :  { %v1713_v6 = vsel %vm150_vm9, %v1712_v24, %v1711_v43 }
 0xf5a   :  { %2738 = vtanh.f32 %v3708_v30 }
 0xf61   :  { %v2737_v31 = vpop.eup %2736 }
 0xf62   :  { %1544 = vrot.lane.b32.xlu0 %v2737_v31, %s2807_s9  ;;  %v1720_v31 = vsel %vm138_vm5, %v1719_v29, %v1718_v39 }
 0xf63   :  { %v1722_v48 = vsel %vm141_vm6, %v1721_v15, %v1720_v31 }
 0xf64   :  { %v1724_v17 = vsel %vm144_vm7, %v1723_v21, %v1722_v48 }
 0xf65   :  { %v1725_v16 = vsel %vm147_vm8, %v1698_v55, %v1724_v17 }
 0xf67   :  { %v2739_v20 = vpop.eup %2738 }
 0xf68   :  { %1616 = vrot.lane.b32.xlu1 %v2739_v20, %s2807_s9  ;;  %v1726_v20 = vrot.slane %v1699_v44, 7 }
 0xf6a   :  { %v1727_v51 = vsel %vm150_vm9, %v1726_v20, %v1725_v16 }
 0xf6b   :  { %v1728_v14 = vpack.c.b16 %v1727_v51, %v1713_v6 }
 0xf6d   :  { %2531 = vmatmul.mubr.msk.bf16.vlgmr.msra.gmra.mxu0 %vm167_vm10, %v1728_v14 }
 0xf6e   :  { %2543 = vmatpush3.bf16.msra.mxu0 %v3385_v63  ;;  %2546 = vmatprep.mubr.msk.bf16.mxu0 %vm2806_vm2, %v2805_v1 }
 0xf6f   :  { %2544 = vmatprep.subr.bf16.mxu0 %v2805_v1 }
 0xf72   :  { %2545 = vmatpush3.bf16.msra.mxu0 %v3394_v8 }
 0xf73   :  { %2556 = vmatprep.subr.bf16.mxu0 %v2805_v1 }
 0xfd4   :  { %v1545_v27 = vpop.permute.xlu0 %1544 }
 0xfd5   :  { %v1547_v28 = vmul.f32 %v3693_v9, %v1545_v27 }
 0xfd7   :  { %v1773_v54 = vpack.c.bf16 %v1547_v28, %v1547_v28 }
 0xfd9   :  { %1775 = vrot.lane.b32.xlu0 %v1773_v54, %s2808_s12 }
 0xfda   :  { %v1617_v59 = vpop.permute.xlu1 %1616 }
 0xfdb   :  { %v1619_v26 = vmul.f32 %v3697_v11, %v1617_v59 }
 0xfdd   :  { %v1845_v60 = vpack.c.bf16 %v1619_v26, %v1619_v26 }
 0xfdf   :  { %1847 = vrot.lane.b32.xlu1 %v1845_v60, %s2808_s12 }
0x102d   :  { %v1766_v29 = vpop.f32.mrf.mxu0 }
0x102e   :  { %v1767_v11 = vadd.f32 %v3687_v22, %v1766_v29 }
0x102f   :  { %v2532_v15 = vpop.f32.mrf.mxu0 }
0x1031   :  { %v1769_v62 = vpop.f32.mrf.mxu0 }
0x1032   :  { %v1770_v43 = vadd.f32 %v3687_v22, %v1769_v62 }
0x1033   :  { %v2533_v24 = vpop.f32.mrf.mxu0 }
0x104b   :  { %v1776_v32 = vpop.permute.xlu0 %1775 }
0x104c   :  { %2539 = vmatmul.mubr.msk.bf16.vlgmr.msra.gmra.mxu1 %vm30_vm1, %v1776_v32 }
0x104d   :  { %2551 = vmatpush3.bf16.msra.mxu1 %v2863_v4  ;;  %2552 = vmatprep.mubr.msk.bf16.mxu1 %vm2806_vm2, %v2805_v1 }
0x104e   :  { %2564 = vmatprep.subr.bf16.mxu1 %v2805_v1 }
0x1051   :  { %v1848_v9 = vpop.permute.xlu1 %1847 }
0x1052   :  { %2547 = vmatmul.mubr.msk.bf16.vlgmr.msra.gmra.mxu0 %vm30_vm1, %v1848_v9 }
0x1053   :  { %2557 = vmatpush3.bf16.msra.mxu0 %v3385_v63  ;;  %2560 = vmatprep.mubr.msk.bf16.mxu0 %vm2806_vm2, %v2805_v1 }
0x1054   :  { %2558 = vmatprep.subr.bf16.mxu0 %v2805_v1 }
0x1057   :  { %2559 = vmatpush3.bf16.msra.mxu0 %v3394_v8 }
0x110c   :  { %v1814_v4 = vpop.f32.mrf.mxu1 }
0x110d   :  { %v1820_v21 = vadd.f32 %v1814_v4, %v1767_v11 }
0x110e   :  { %v2540_v38 = vpop.f32.mrf.mxu1 }
0x110f   :  { %2740 = vtanh.f32 %v1820_v21  ;;  %v2321_v27 = vmul.f32 -1.442695, %v1820_v21 }
0x1110   :  { %v1817_v39 = vpop.f32.mrf.mxu1 }
0x1112   :  { %v2541_v31 = vpop.f32.mrf.mxu1  ;;  %v1886_v20 = vpop.f32.mrf.mxu0 }
0x1113   :  { %v1892_v48 = vadd.f32 %v1886_v20, %v1770_v43  ;;  %v1917_v31 = vrot.slane %v1684_v46, 7  ;;  %v1918_v20 = vrot.slane %v1685_v25, 6 }
0x1114   :  { %v2548_v6 = vpop.f32.mrf.mxu0 }
0x1115   :  { %2742 = vtanh.f32 %v1892_v48  ;;  %v2323_v28 = vmul.f32 -1.442695, %v1892_v48  ;;  %v1922_v48 = vrot.slane %v1687_v50, 4  ;;  %v1926_v6 = vrot.slane %v1689_v61, 2 }
0x1116   :  { %v1889_v17 = vpop.f32.mrf.mxu0  ;;  %2744 = vpow2.f32 %v2321_v27  ;;  %v1919_v46 = vsel %vm132_vm3, %v1918_v20, %v1917_v31  ;;  %v1942_v50 = vrot.slane %v1698_v55, 1 }
0x1117   :  { %2746 = vpow2.f32 %v2323_v28  ;;  %v1931_v17 = vrot.slane %v1692_v0, 7 }
0x1118   :  { %v2549_v16 = vpop.f32.mrf.mxu0 }
0x1119   :  { %v1933_v2 = vsel %vm132_vm3, %v1932_v23, %v1931_v17 }
0x111c   :  { %v2741_v51 = vpop.eup %2740 }
0x111d   :  { %1830 = vrot.lane.b32.xlu0 %v2741_v51, %s2807_s9 }
0x1122   :  { %v2743_v14 = vpop.eup %2742 }
0x1123   :  { %1902 = vrot.lane.b32.xlu1 %v2743_v14, %s2807_s9  ;;  %v2745_v54 = vpop.eup %2744 }
0x1124   :  { %v1824_v59 = vadd.f32 1.0, %v2745_v54  ;;  %v2747_v26 = vpop.eup %2746 }
0x1125   :  { %v1896_v60 = vadd.f32 1.0, %v2747_v26 }
0x1126   :  { %2748 = vrcp.f32 %v1824_v59 }
0x1127   :  { %2750 = vrcp.f32 %v1896_v60 }
0x1133   :  { %v2749_v29 = vpop.eup %2748 }
0x1134   :  { %v2751_v24 = vpop.eup %2750  ;;  %v1828_v11 = vmul.f32 %v2749_v29, %v3703_v42  ;;  %v1920_v42 = vrot.slane %v1686_v37, 5  ;;  %v1935_v37 = vsel %vm135_vm4, %v1934_v10, %v1933_v2 }
0x1135   :  { %v1900_v38 = vmul.f32 %v2751_v24, %v3708_v30  ;;  %v1924_v30 = vrot.slane %v1688_v58, 3  ;;  %v1937_v58 = vsel %vm138_vm5, %v1936_v33, %v1935_v37  ;;  %v2329_v37 = vld [vmem:[%s3980_s4] ss:$0 sm:$0xff]  ;;  %s2810_s4 = smov [#allocation5]  }
0x1136   :  { %v1921_v35 = vsel %vm135_vm4, %v1920_v42, %v1919_v46  ;;  %v1939_v61 = vsel %vm141_vm6, %v1938_v52, %v1937_v58 }
0x1137   :  { %v1923_v25 = vsel %vm138_vm5, %v1922_v48, %v1921_v35  ;;  %v1941_v0 = vsel %vm144_vm7, %v1940_v40, %v1939_v61 }
0x1138   :  { %v1925_v53 = vsel %vm141_vm6, %v1924_v30, %v1923_v25  ;;  %v1943_v7 = vsel %vm147_vm8, %v1942_v50, %v1941_v0 }
0x1139   :  { %v1927_v34 = vsel %vm144_vm7, %v1926_v6, %v1925_v53  ;;  %v1944_v19 = vsel %vm150_vm9, %v1699_v44, %v1943_v7 }
0x113a   :  { %v1929_v56 = vsel %vm147_vm8, %v1928_v45, %v1927_v34 }
0x113b   :  { %v1930_v57 = vsel %vm150_vm9, %v1691_v41, %v1929_v56 }
0x113c   :  { %v1945_v36 = vpack.c.b16 %v1944_v19, %v1930_v57  ;;  %v2175_v57 = vstv %s3981_s5  ;;  %s2214_s5 = sshll.u32 %s2810_s4, 4  ;;  %s2215_s5 = int_to_ptr.vmem [resolvable:$true] %s2214_s5 }
0x113d   :  { %s2783_s20 = scalar_lea.vmem %s2215_s5, 16  ;;  %s2787_s21 = scalar_lea.vmem %s2215_s5, 32 }
0x113e   :  { %2553 = vmatmul.mubr.msk.bf16.vlgmr.msra.gmra.mxu1 %vm167_vm10, %v1945_v36  ;;  %p2784_p0 = scmp.ne.s32.totalorder %s2215_s5, %s2783_s20  ;;  %p2788_p1 = scmp.lt.s32.totalorder %s2215_s5, %s2215_s5 }
0x113f   :  { %2565 = vmatpush3.bf16.msra.mxu1 %v3385_v63  ;;  %2568 = vmatprep.mubr.msk.bf16.mxu1 %vm2806_vm2, %v2805_v1  ;;  %p2789_p2 = scmp.lt.s32.totalorder %s2787_s21, %s2783_s20 }
0x1140   :  { %2566 = vmatprep.subr.bf16.mxu1 %v2805_v1 }
0x1141   :  { %p2790_p3 = por %p2789_p2, %p2788_p1 }
0x1143   :  { %2567 = vmatpush3.bf16.msra.mxu1 %v3394_v8  ;;  %p2791_p4 = pnand %p2790_p3, %p2784_p0 }
0x118f   :  { %v1831_v15 = vpop.permute.xlu0 %1830 }
0x1190   :  { %v1833_v62 = vmul.f32 %v2749_v29, %v1831_v15 }
0x1192   :  { %1835 = vrot.lane.b32.xlu0 %v1833_v62, %s2807_s9 }
0x1195   :  { %v1903_v32 = vpop.permute.xlu1 %1902 }
0x1196   :  { %v1905_v9 = vmul.f32 %v2751_v24, %v1903_v32 }
0x1198   :  { %1907 = vrot.lane.b32.xlu1 %v1905_v9, %s2807_s9 }
0x11fe   :  { %v1983_v44 = vpop.f32.mrf.mxu1 }
0x11ff   :  { %v1984_v8 = vadd.f32 %v3687_v22, %v1983_v44 }
0x1200   :  { %v2554_v55 = vpop.f32.mrf.mxu1 }
0x1202   :  { %v1986_v63 = vpop.f32.mrf.mxu1 }
0x1203   :  { %v1987_v59 = vadd.f32 %v3687_v22, %v1986_v63  ;;  %v2192_v63 = vlaneseq }
0x1204   :  { %v1836_v4 = vpop.permute.xlu0 %1835  ;;  %v2555_v16 = vpop.f32.mrf.mxu1 }
0x1205   :  { %v3884_v21 = vadd.f32 %v1836_v4, %v1828_v11  ;;  %v2193_v16 = vand.u32 127, %v2192_v63 }
0x1207   :  { %2752 = vtanh.f32 %v3884_v21 }
0x120a   :  { %v1908_v39 = vpop.permute.xlu1 %1907 }
0x120b   :  { %v3888_v43 = vadd.f32 %v1908_v39, %v1900_v38 }
0x120d   :  { %2754 = vtanh.f32 %v3888_v43 }
0x1214   :  { %v2753_v3 = vpop.eup %2752 }
0x1215   :  { %1841 = vrot.lane.b32.xlu0 %v2753_v3, %s2807_s9 }
0x121a   :  { %v2755_v18 = vpop.eup %2754 }
0x121b   :  { %1913 = vrot.lane.b32.xlu1 %v2755_v18, %s2807_s9 }
0x1287   :  { %v1842_v49 = vpop.permute.xlu0 %1841 }
0x1288   :  { %v1844_v12 = vmul.f32 %v2749_v29, %v1842_v49 }
0x128a   :  { %v1990_v41 = vpack.c.bf16 %v1844_v12, %v1844_v12 }
0x128c   :  { %1992 = vrot.lane.b32.xlu0 %v1990_v41, %s2808_s12 }
0x128d   :  { %v1914_v5 = vpop.permute.xlu1 %1913 }
0x128e   :  { %v1916_v47 = vmul.f32 %v2751_v24, %v1914_v5 }
0x1290   :  { %v2062_v13 = vpack.c.bf16 %v1916_v47, %v1916_v47 }
0x1292   :  { %2064 = vrot.lane.b32.xlu1 %v2062_v13, %s2808_s12 }
0x12fe   :  { %v1993_v51 = vpop.permute.xlu0 %1992 }
0x12ff   :  { %2561 = vmatmul.mubr.msk.bf16.vlgmr.msra.gmra.mxu0 %vm30_vm1, %v1993_v51  ;;  %v2195_v51 = vshrl.u32 %v2192_v63, 7 }
0x1304   :  { %v2065_v1 = vpop.permute.xlu1 %2064 }
0x1305   :  { %2569 = vmatmul.mubr.msk.bf16.vlgmr.msra.gmra.mxu1 %vm30_vm1, %v2065_v1  ;;  %v2198_v1 = vadd.s32 4294967288, %v2193_v16 }
0x13bf   :  { %v2031_v14 = vpop.f32.mrf.mxu0 }
0x13c0   :  { %v2037_v27 = vadd.f32 %v2031_v14, %v1984_v8  ;;  %v2196_v8 = vsub.s32 %v2193_v16, %v2195_v51  ;;  %v2201_v14 = vsub.s32 %v2198_v1, %v2195_v51 }
0x13c1   :  { %v2562_v28 = vpop.f32.mrf.mxu0 }
0x13c2   :  { %2756 = vtanh.f32 %v2037_v27  ;;  %v2326_v11 = vmul.f32 -1.442695, %v2037_v27 }
0x13c3   :  { %v2034_v54 = vpop.f32.mrf.mxu0 }
0x13c5   :  { %v2563_v26 = vpop.f32.mrf.mxu0  ;;  %v2103_v60 = vpop.f32.mrf.mxu1 }
0x13c6   :  { %v2109_v29 = vadd.f32 %v2103_v60, %v1987_v59 }
0x13c7   :  { %v2570_v15 = vpop.f32.mrf.mxu1 }
0x13c8   :  { %2758 = vtanh.f32 %v2109_v29  ;;  %v2328_v4 = vmul.f32 -1.442695, %v2109_v29 }
0x13c9   :  { %v2106_v62 = vpop.f32.mrf.mxu1  ;;  %2760 = vpow2.f32 %v2326_v11 }
0x13ca   :  { %2762 = vpow2.f32 %v2328_v4 }
0x13cb   :  { %v2571_v24 = vpop.f32.mrf.mxu1 }
0x13cf   :  { %v2757_v32 = vpop.eup %2756 }
0x13d0   :  { %2047 = vrot.lane.b32.xlu0 %v2757_v32, %s2807_s9 }
0x13d5   :  { %v2759_v9 = vpop.eup %2758 }
0x13d6   :  { %2119 = vrot.lane.b32.xlu1 %v2759_v9, %s2807_s9  ;;  %v2761_v38 = vpop.eup %2760 }
0x13d7   :  { %v2041_v39 = vadd.f32 1.0, %v2761_v38  ;;  %v2763_v22 = vpop.eup %2762 }
0x13d8   :  { %v2113_v31 = vadd.f32 1.0, %v2763_v22 }
0x13d9   :  { %2764 = vrcp.f32 %v2041_v39 }
0x13da   :  { %2766 = vrcp.f32 %v2113_v31 }
0x13e6   :  { %v2765_v20 = vpop.eup %2764 }
0x13e7   :  { %v2767_v30 = vpop.eup %2766  ;;  %v2045_v3 = vmul.f32 %v2765_v20, %v3884_v21 }
0x13e8   :  { %v2117_v10 = vmul.f32 %v2767_v30, %v3888_v43 }
0x1442   :  { %v2048_v42 = vpop.permute.xlu0 %2047 }
0x1443   :  { %v2050_v48 = vmul.f32 %v2765_v20, %v2048_v42 }
0x1445   :  { %2052 = vrot.lane.b32.xlu0 %v2050_v48, %s2807_s9 }
0x1448   :  { %v2120_v6 = vpop.permute.xlu1 %2119 }
0x1449   :  { %v2122_v17 = vmul.f32 %v2767_v30, %v2120_v6 }
0x144b   :  { %2124 = vrot.lane.b32.xlu1 %v2122_v17, %s2807_s9 }
0x14b7   :  { %v2053_v46 = vpop.permute.xlu0 %2052 }
0x14b8   :  { %v2055_v23 = vadd.f32 %v2053_v46, %v2045_v3 }
0x14ba   :  { %2768 = vtanh.f32 %v2055_v23 }
0x14bd   :  { %v2125_v33 = vpop.permute.xlu1 %2124 }
0x14be   :  { %v2127_v35 = vadd.f32 %v2125_v33, %v2117_v10 }
0x14c0   :  { %2770 = vtanh.f32 %v2127_v35 }
0x14c7   :  { %v2769_v45 = vpop.eup %2768 }
0x14c8   :  { %2058 = vrot.lane.b32.xlu0 %v2769_v45, %s2807_s9 }
0x14cd   :  { %v2771_v52 = vpop.eup %2770 }
0x14ce   :  { %2130 = vrot.lane.b32.xlu1 %v2771_v52, %s2807_s9  ;;  %s2809_s9 = smov 96  }
0x153a   :  { %v2059_v25 = vpop.permute.xlu0 %2058 }
0x153b   :  { %v2061_v2 = vmul.f32 %v2765_v20, %v2059_v25 }
0x153d   :  { %2135 = vrot.lane.b32.xlu0 %v2061_v2, %s2808_s12 }
0x1540   :  { %v2131_v40 = vpop.permute.xlu1 %2130 }
0x1541   :  { %v2133_v21 = vmul.f32 %v2767_v30, %v2131_v40 }
0x1543   :  { %2140 = vrot.lane.b32.xlu1 %v2133_v21, %s2808_s12 }
0x15af   :  { %v2136_v53 = vpop.permute.xlu0 %2135 }
0x15b0   :  { %2138 = vst.msk [vmem:[#allocation2] sm:$0xff] %vm30_vm1, %v2136_v53 }
0x15b5   :  { %v2141_v43 = vpop.permute.xlu1 %2140 }
0x15b6   :  { %2143 = vst.msk [vmem:[#allocation2 + $0x8] sm:$0xff] %vm30_vm1, %v2141_v43 }
0x15b7   :  { %v2157_v50 = vld [vmem:[#allocation2] sm:$0xff] }
0x15b8   :  { %v2166_v34 = vmul.f32 %v2329_v37, %v2157_v50 }
0x15ba   :  { %v2168_v58 = vsel %vm30_vm1, %v2166_v34, 0.0 }
0x15bb   :  { %2169 = vadd.xlane.f32.xlu0 %v2168_v58 }
0x15bd   :  { %v2158_v56 = vld [vmem:[#allocation2 + $0x8] sm:$0xff] }
0x15be   :  { %v2167_v61 = vmul.f32 %v2329_v37, %v2158_v56 }
0x15c0   :  { %v2171_v18 = vsel %vm30_vm1, %v2167_v61, 0.0 }
0x15c1   :  { %2172 = vadd.xlane.f32.xlu1 %v2171_v18 }
0x15d1   :  { %2145 = vrot.lane.b32.xlu0 %v2055_v23, %s2809_s9 }
0x15d2   :  { %2150 = vrot.lane.b32.xlu1 %v2127_v35, %s2809_s9 }
0x1644   :  { %v2170_v0 = vpop.xlane.xlu0 %2169 }
0x1645   :  { %v2176_v7 = vadd.f32 %v2175_v57, %v2170_v0 }
0x1647   :  { %v2330_v19 = vmul.f32 -1.442695, %v2176_v7 }
0x1648   :  { %v2146_v36 = vpop.permute.xlu0 %2145 }
0x1649   :  { %2772 = vpow2.f32 %v2330_v19  ;;  %2148 = vst.msk [vmem:[#allocation3] sm:$0xff] %vm30_vm1, %v2146_v36 }
0x164a   :  { %v2173_v49 = vpop.xlane.xlu1 %2172 }
0x164b   :  { %v2177_v12 = vadd.f32 %v2175_v57, %v2173_v49 }
0x164d   :  { %v2331_v41 = vmul.f32 -1.442695, %v2177_v12 }
0x164e   :  { %v2151_v5 = vpop.permute.xlu1 %2150 }
0x164f   :  { %2774 = vpow2.f32 %v2331_v41  ;;  %2153 = vst.msk [vmem:[#allocation3 + $0x8] sm:$0xff] %vm30_vm1, %v2151_v5 }
0x1656   :  { %v2773_v47 = vpop.eup %2772 }
0x1657   :  { %v2184_v13 = vadd.f32 1.0, %v2773_v47 }
0x1659   :  { %2776 = vrcp.f32 %v2184_v13 }
0x165c   :  { %v2775_v44 = vpop.eup %2774 }
0x165d   :  { %v2185_v55 = vadd.f32 1.0, %v2775_v44 }
0x165f   :  { %2778 = vrcp.f32 %v2185_v55 }
0x1666   :  { %v2777_v27 = vpop.eup %2776 }
0x1667   :  { %v2197_v54 = vrot.slane %v2777_v27, %v2196_v8 }
0x166c   :  { %v2779_v28 = vpop.eup %2778 }
0x166d   :  { %v2202_v59 = vrot.slane %v2779_v28, %v2201_v14 }
0x166f   :  { %v2204_v26 = vsel %vm2203_vm11, %v2202_v59, %v2197_v54 }
0x1670   :  { %2207 = vst.msk [vmem:[#allocation5] sm:$0x1] %vm2206_vm12, %v2204_v26 }
0x1671   :  { %2794 = shalt.err (!%p2791_p4)
}
0x1672   :  { %2217 = dma.vmem_to_hbm [thread:$0]  %s2215_s5, 16, %s3982_s6, [#allocation6]  }
0x1673   :  { %2803 = dma.done.wait [#allocation6], 16  }
0x1674   :  { %2804 = vsyncadd [#allocation6], 4294967280 }
0x1675   :  { %2221 = vsyncpa [#allocation6], 1 }

</bundles_post_ra>
